<compile_context>
chip_gen: v7x
topology: tpu7x:2x2x1
jax: 0.10.0
libtpu: 0.0.40
codegen_flags: <defaults>
</compile_context>

<pallas_src>
import math
import functools

import jax
import jax.numpy as jnp
from jax.experimental import pallas as pl
from jax.experimental.pallas import tpu as pltpu


# ------------------------------- helpers ------------------------------------


def _pick_bm(m, target=512):
    """Largest row-tile (multiple of 8, <= target) that divides m and leaves >=2
    grid steps; falls back to a single full-extent block."""
    best = None
    for d in (8, 16, 32, 64, 128, 256, 512):
        if d <= target and d < m and m % d == 0:
            best = d
    return best if best is not None else m


_DN = (((1,), (1,)), ((), ()))   # contract last dim of x with last dim of (N,K) weight


# ----------------------------- Pallas kernels -------------------------------


def _proj_kernel(x_ref, w_ref, b_ref, scale_ref, o_ref):
    # o = (x @ W^T + b) * scale      W is torch-layout (N, K), bf16; acc in f32.
    x = x_ref[...].astype(jnp.bfloat16)
    y = jax.lax.dot_general(x, w_ref[...], _DN, preferred_element_type=jnp.float32)
    o_ref[...] = ((y + b_ref[...]) * scale_ref[...]).astype(o_ref.dtype)


def _matmul_residual_ln_kernel(ctx_ref, res_ref, w_ref, b_ref, g_ref, beta_ref, o_ref):
    # o = LayerNorm(residual + ctx @ W^T + b)   (fused out-proj epilogue, eps=1e-5)
    ctx = ctx_ref[...].astype(jnp.bfloat16)
    y = jax.lax.dot_general(ctx, w_ref[...], _DN,
                            preferred_element_type=jnp.float32) + b_ref[...]
    x = res_ref[...] + y
    mu = jnp.mean(x, axis=-1, keepdims=True)
    var = jnp.mean((x - mu) * (x - mu), axis=-1, keepdims=True)
    o_ref[...] = (x - mu) * jax.lax.rsqrt(var + 1e-5) * g_ref[...] + beta_ref[...]


def _ffn_residual_ln_kernel(x_ref, w1_ref, b1_ref, w2_ref, b2_ref, g_ref, beta_ref,
                            o_ref):
    # o = LayerNorm(x + relu(x @ W1^T + b1) @ W2^T + b2)
    x = x_ref[...]                                            # f32 residual
    h = jax.lax.dot_general(x.astype(jnp.bfloat16), w1_ref[...], _DN,
                            preferred_element_type=jnp.float32) + b1_ref[...]
    h = jnp.maximum(h, 0.0)
    y = jax.lax.dot_general(h.astype(jnp.bfloat16), w2_ref[...], _DN,
                            preferred_element_type=jnp.float32) + b2_ref[...]
    z = x + y
    mu = jnp.mean(z, axis=-1, keepdims=True)
    var = jnp.mean((z - mu) * (z - mu), axis=-1, keepdims=True)
    o_ref[...] = (z - mu) * jax.lax.rsqrt(var + 1e-5) * g_ref[...] + beta_ref[...]


def _self_attn_kernel(qkv_ref, o_ref, *, num_heads, embed_dim):
    # One batch per grid step; all heads processed here (lane-dense (T, E) tiles).
    # q is already scaled by head_dim**-0.5.  need_weights=False -> no prob output.
    E = embed_dim
    Dh = E // num_heads
    qkv = qkv_ref[...].astype(jnp.bfloat16)                    # (T, 3E)
    q = qkv[:, :E]
    k = qkv[:, E:2 * E]
    v = qkv[:, 2 * E:]
    outs = []
    for h in range(num_heads):
        sl = slice(h * Dh, (h + 1) * Dh)
        s = jax.lax.dot_general(q[:, sl], k[:, sl], _DN,
                                preferred_element_type=jnp.float32)   # (T, T)
        m = jnp.max(s, axis=-1, keepdims=True)
        e = jnp.exp(s - m)
        p = e * pl.reciprocal(jnp.sum(e, axis=-1, keepdims=True), approx=True)
        outs.append(jnp.dot(p.astype(jnp.bfloat16), v[:, sl],
                            preferred_element_type=jnp.float32))
    o_ref[...] = jnp.concatenate(outs, axis=-1).astype(o_ref.dtype)


def _enc_attn_kernel(q_ref, kv_ref, bias_ref, o_ref, attn_ref, *, num_heads,
                     embed_dim):
    # One batch per grid step.  Head-averaged attention weights accumulated
    # in-kernel -> only (T, S) written back (no (H, T, S) HBM writeback).
    E = embed_dim
    Dh = E // num_heads
    q = q_ref[...].astype(jnp.bfloat16)                        # (T, E), pre-scaled
    kv = kv_ref[...].astype(jnp.bfloat16)                      # (S, 2E)
    k = kv[:, :E]
    v = kv[:, E:]
    bias = bias_ref[0]                                         # (1, S): 0 or -1e30
    acc = jnp.zeros(attn_ref.shape[1:], jnp.float32)           # (T, S)
    outs = []
    for h in range(num_heads):
        sl = slice(h * Dh, (h + 1) * Dh)
        s = jax.lax.dot_general(q[:, sl], k[:, sl], _DN,
                                preferred_element_type=jnp.float32) + bias
        m = jnp.max(s, axis=-1, keepdims=True)
        e = jnp.exp(s - m)
        p = e * pl.reciprocal(jnp.sum(e, axis=-1, keepdims=True), approx=True)
        outs.append(jnp.dot(p.astype(jnp.bfloat16), v[:, sl],
                            preferred_element_type=jnp.float32))
        acc = acc + p
    o_ref[...] = jnp.concatenate(outs, axis=-1).astype(o_ref.dtype)
    attn_ref[0] = acc * (1.0 / num_heads)


# ----------------------------- kernel wrappers -------------------------------

_PARALLEL_1D = pltpu.CompilerParams(dimension_semantics=("parallel",))


def fused_proj(x, w, b, scale=None, bm=None):
    """o = (x @ W^T + b) * scale.  x: (M, K) f32, w: (N, K) torch layout."""
    M, K = x.shape
    N = w.shape[0]
    if bm is None:
        bm = _pick_bm(M)
    if scale is None:
        scale = jnp.ones((N,), jnp.float32)
    return pl.pallas_call(
        _proj_kernel,
        out_shape=jax.ShapeDtypeStruct((M, N), jnp.float32),
        grid=(M // bm,),
        in_specs=[
            pl.BlockSpec((bm, K), lambda i: (i, 0)),
            pl.BlockSpec((N, K), lambda i: (0, 0)),
            pl.BlockSpec((1, N), lambda i: (0, 0)),
            pl.BlockSpec((1, N), lambda i: (0, 0)),
        ],
        out_specs=pl.BlockSpec((bm, N), lambda i: (i, 0)),
        compiler_params=_PARALLEL_1D,
    )(x, w.astype(jnp.bfloat16), b.reshape(1, N).astype(jnp.float32),
      scale.reshape(1, N).astype(jnp.float32))


def matmul_residual_ln(ctx, residual, w, b, gamma, beta, bm=None):
    """LayerNorm(residual + ctx @ W^T + b)."""
    M, _ = ctx.shape
    N, K = w.shape
    if bm is None:
        bm = _pick_bm(M)
    return pl.pallas_call(
        _matmul_residual_ln_kernel,
        out_shape=jax.ShapeDtypeStruct((M, N), jnp.float32),
        grid=(M // bm,),
        in_specs=[
            pl.BlockSpec((bm, K), lambda i: (i, 0)),
            pl.BlockSpec((bm, N), lambda i: (i, 0)),
            pl.BlockSpec((N, K), lambda i: (0, 0)),
            pl.BlockSpec((1, N), lambda i: (0, 0)),
            pl.BlockSpec((1, N), lambda i: (0, 0)),
            pl.BlockSpec((1, N), lambda i: (0, 0)),
        ],
        out_specs=pl.BlockSpec((bm, N), lambda i: (i, 0)),
        compiler_params=_PARALLEL_1D,
    )(ctx, residual, w.astype(jnp.bfloat16), b.reshape(1, N).astype(jnp.float32),
      gamma.reshape(1, N).astype(jnp.float32), beta.reshape(1, N).astype(jnp.float32))


def ffn_residual_ln(x, w1, b1, w2, b2, gamma, beta, bm=None):
    """LayerNorm(x + relu(x @ W1^T + b1) @ W2^T + b2)."""
    M, E = x.shape
    F = w1.shape[0]
    if bm is None:
        bm = _pick_bm(M)
    return pl.pallas_call(
        _ffn_residual_ln_kernel,
        out_shape=jax.ShapeDtypeStruct((M, E), jnp.float32),
        grid=(M // bm,),
        in_specs=[
            pl.BlockSpec((bm, E), lambda i: (i, 0)),
            pl.BlockSpec((F, E), lambda i: (0, 0)),
            pl.BlockSpec((1, F), lambda i: (0, 0)),
            pl.BlockSpec((E, F), lambda i: (0, 0)),
            pl.BlockSpec((1, E), lambda i: (0, 0)),
            pl.BlockSpec((1, E), lambda i: (0, 0)),
            pl.BlockSpec((1, E), lambda i: (0, 0)),
        ],
        out_specs=pl.BlockSpec((bm, E), lambda i: (i, 0)),
        compiler_params=_PARALLEL_1D,
    )(x, w1.astype(jnp.bfloat16), b1.reshape(1, F).astype(jnp.float32),
      w2.astype(jnp.bfloat16), b2.reshape(1, E).astype(jnp.float32),
      gamma.reshape(1, E).astype(jnp.float32), beta.reshape(1, E).astype(jnp.float32))


def self_attention(qkv, B, T, num_heads, embed_dim):
    """qkv: (B*T, 3E) batch-contiguous rows -> context (B*T, E)."""
    E = embed_dim
    kern = functools.partial(_self_attn_kernel, num_heads=num_heads, embed_dim=E)
    return pl.pallas_call(
        kern,
        out_shape=jax.ShapeDtypeStruct((B * T, E), jnp.float32),
        grid=(B,),
        in_specs=[pl.BlockSpec((T, 3 * E), lambda b: (b, 0))],
        out_specs=pl.BlockSpec((T, E), lambda b: (b, 0)),
        compiler_params=_PARALLEL_1D,
    )(qkv)


def encoder_attention(q, kv, bias, B, T, S, num_heads, embed_dim):
    """q: (B*T, E) scaled, kv: (B*S, 2E), bias: (B, 1, S) additive (0 / -1e30).

    Returns (context (B*T, E), head-averaged attention (B, T, S))."""
    E = embed_dim
    kern = functools.partial(_enc_attn_kernel, num_heads=num_heads, embed_dim=E)
    return pl.pallas_call(
        kern,
        out_shape=(jax.ShapeDtypeStruct((B * T, E), jnp.float32),
                   jax.ShapeDtypeStruct((B, T, S), jnp.float32)),
        grid=(B,),
        in_specs=[
            pl.BlockSpec((T, E), lambda b: (b, 0)),
            pl.BlockSpec((S, 2 * E), lambda b: (b, 0)),
            pl.BlockSpec((1, 1, S), lambda b: (b, 0, 0)),
        ],
        out_specs=(pl.BlockSpec((T, E), lambda b: (b, 0)),
                   pl.BlockSpec((1, T, S), lambda b: (b, 0, 0))),
        compiler_params=_PARALLEL_1D,
    )(q, kv, bias)


# --------------------------- decoder layer forward ---------------------------


def transformer_decoder_layer_forward(x, encoder_out, encoder_padding_mask, params,
                                      num_heads):
    """x: (T, B, E); encoder_out: (S, B, E); encoder_padding_mask: (B, S) 1=pad.

    normalize_before=False (post-LN). Returns (x (T, B, E), attn (B, T, S))."""
    T, B, E = x.shape
    S = encoder_out.shape[0]
    H = num_heads
    Dh = E // H
    scaling = Dh ** -0.5

    # Batch-contiguous row layout (one transpose at each boundary; the per-head
    # split/merge transposes of the old version are gone).
    x2d = x.transpose(1, 0, 2).reshape(B * T, E)
    enc2d = encoder_out.transpose(1, 0, 2).reshape(B * S, E)

    # --- self attention block ---
    sa = params["self_attn"]
    qkv_scale = jnp.concatenate([jnp.full((E,), scaling, jnp.float32),
                                 jnp.ones((2 * E,), jnp.float32)])
    qkv = fused_proj(x2d, sa["in_proj_w"], sa["in_proj_b"], scale=qkv_scale)
    ctx = self_attention(qkv, B, T, H, E)
    # TODO(synk): no causal self_attn_mask is applied (the standalone forward here
    # passes self_attn_mask=None, matching the previous version's semantics).
    x1 = matmul_residual_ln(ctx, x2d, sa["out_proj_w"], sa["out_proj_b"],
                            params["self_attn_ln_g"], params["self_attn_ln_b"])

    # --- encoder attention block ---
    ea = params["encoder_attn"]
    q_enc = fused_proj(x1, ea["in_proj_w"][:E], ea["in_proj_b"][:E],
                       scale=jnp.full((E,), scaling, jnp.float32))
    kv_enc = fused_proj(enc2d, ea["in_proj_w"][E:], ea["in_proj_b"][E:])
    if encoder_padding_mask is None:
        bias = jnp.zeros((B, 1, S), jnp.float32)
    else:
        bias = (encoder_padding_mask.astype(jnp.float32) * -1e30).reshape(B, 1, S)
    ctx2, attn = encoder_attention(q_enc, kv_enc, bias, B, T, S, H, E)
    x2 = matmul_residual_ln(ctx2, x1, ea["out_proj_w"], ea["out_proj_b"],
                            params["encoder_attn_ln_g"], params["encoder_attn_ln_b"])

    # --- feed-forward block (fc1 + relu + fc2 + residual + LN, fully fused) ---
    x3 = ffn_residual_ln(x2, params["fc1_w"], params["fc1_b"],
                         params["fc2_w"], params["fc2_b"],
                         params["final_ln_g"], params["final_ln_b"])

    out = x3.reshape(B, T, E).transpose(1, 0, 2)
    return out, attn


# ------------------------- pure-JAX reference (f32) --------------------------


def _reference_forward(x, encoder_out, encoder_padding_mask, params, num_heads):
    T, B, E = x.shape
    S = encoder_out.shape[0]
    H = num_heads
    Dh = E // H
    scaling = Dh ** -0.5

    def ln(v, g, b):
        mu = v.mean(-1, keepdims=True)
        var = ((v - mu) ** 2).mean(-1, keepdims=True)
        return (v - mu) / jnp.sqrt(var + 1e-5) * g + b

    def mha(query, key, value, p, mask=None, need_weights=False):
        Tq, Sk = query.shape[0], key.shape[0]
        w, bias = p["in_proj_w"], p["in_proj_b"]
        q = (query @ w[:E].T + bias[:E]) * scaling
        k = key @ w[E:2 * E].T + bias[E:2 * E]
        v = value @ w[2 * E:].T + bias[2 * E:]

        def split(t, L):
            return t.reshape(L, B, H, Dh).transpose(1, 2, 0, 3)

        qh, kh, vh = split(q, Tq), split(k, Sk), split(v, Sk)
        s = jnp.einsum("bhqd,bhkd->bhqk", qh, kh)
        if mask is not None:
            s = jnp.where(mask[:, None, None, :] > 0.5, -jnp.inf, s)
        pr = jax.nn.softmax(s, axis=-1)
        o = jnp.einsum("bhqk,bhkd->bhqd", pr, vh)
        o = o.transpose(2, 0, 1, 3).reshape(Tq, B, E)
        o = o @ p["out_proj_w"].T + p["out_proj_b"]
        return o, (pr.mean(axis=1) if need_weights else None)

    res = x
    y, _ = mha(x, x, x, params["self_attn"])
    x1 = ln(res + y, params["self_attn_ln_g"], params["self_attn_ln_b"])
    res = x1
    y, attn = mha(x1, encoder_out, encoder_out, params["encoder_attn"],
                  mask=encoder_padding_mask, need_weights=True)
    x2 = ln(res + y, params["encoder_attn_ln_g"], params["encoder_attn_ln_b"])
    res = x2
    h = jnp.maximum(x2 @ params["fc1_w"].T + params["fc1_b"], 0.0)
    y = h @ params["fc2_w"].T + params["fc2_b"]
    x3 = ln(res + y, params["final_ln_g"], params["final_ln_b"])
    return x3, attn


# ------------------------------- init / main ---------------------------------


def xavier_uniform(key, shape):
    fan_out, fan_in = shape
    bound = math.sqrt(6.0 / (fan_in + fan_out))
    return jax.random.uniform(key, shape, jnp.float32, -bound, bound)


def init_params(key, embed_dim, ffn_dim):
    keys = jax.random.split(key, 8)
    E, F = embed_dim, ffn_dim

    def mha_params(k1, k2):
        return {
            "in_proj_w": xavier_uniform(k1, (3 * E, E)),
            "in_proj_b": jnp.zeros((3 * E,), jnp.float32),
            "out_proj_w": xavier_uniform(k2, (E, E)),
            "out_proj_b": jnp.zeros((E,), jnp.float32),
        }

    return {
        "self_attn": mha_params(keys[0], keys[1]),
        "encoder_attn": mha_params(keys[2], keys[3]),
        "self_attn_ln_g": jnp.ones((E,), jnp.float32),
        "self_attn_ln_b": jnp.zeros((E,), jnp.float32),
        "encoder_attn_ln_g": jnp.ones((E,), jnp.float32),
        "encoder_attn_ln_b": jnp.zeros((E,), jnp.float32),
        "fc1_w": xavier_uniform(keys[4], (F, E)),
        "fc1_b": jnp.zeros((F,), jnp.float32),
        "fc2_w": xavier_uniform(keys[5], (E, F)),
        "fc2_b": jnp.zeros((E,), jnp.float32),
        "final_ln_g": jnp.ones((E,), jnp.float32),
        "final_ln_b": jnp.zeros((E,), jnp.float32),
    }


if __name__ == "__main__":
    # Small config: decoder_embed_dim=32, heads=4, ffn=64, tgt_len=8, src_len=8, batch=2
    T, S, B, E, H, F = 8, 8, 2, 32, 4, 64

    root = jax.random.PRNGKey(0)
    k_param, k_x, k_enc = jax.random.split(root, 3)

    params = init_params(k_param, E, F)
    x = jax.random.normal(k_x, (T, B, E), jnp.float32)              # (seq_len, batch, embed)
    encoder_out = jax.random.normal(k_enc, (S, B, E), jnp.float32)  # (src_len, batch, embed)
    # encoder_padding_mask: (batch, src_len), 1 marks padding; pad last 2 keys of batch 1
    encoder_padding_mask = jnp.zeros((B, S), jnp.float32).at[1, -2:].set(1.0)

    fwd = jax.jit(functools.partial(transformer_decoder_layer_forward, num_heads=H))
    out, attn = fwd(x, encoder_out, encoder_padding_mask, params)
    jax.block_until_ready((out, attn))

    ref_out, ref_attn = _reference_forward(x, encoder_out, encoder_padding_mask,
                                           params, H)

    assert out.shape == (T, B, E)
    assert attn.shape == (B, T, S)
    assert bool(jnp.all(jnp.isfinite(out)))
    # bf16 MXU operands + approximate softmax reciprocal -> loose tolerance vs f32 ref.
    assert float(jnp.max(jnp.abs(out - ref_out))) < 0.25
    assert float(jnp.max(jnp.abs(attn - ref_attn))) < 0.1
    print("KERNEL_OK")
</pallas_src>

<mosaic_0001>
module attributes {stable_mosaic.version = 11 : i64} {
  func.func @_proj_kernel(%arg0: i32, %arg1: memref<8x32xf32, #tpu.memory_space<vmem>>, %arg2: memref<96x32xbf16, #tpu.memory_space<vmem>>, %arg3: memref<1x96xf32, #tpu.memory_space<vmem>>, %arg4: memref<1x96xf32, #tpu.memory_space<vmem>>, %arg5: memref<8x96xf32, #tpu.memory_space<vmem>>) attributes {dimension_semantics = [#tpu.dimension_semantics<parallel>], iteration_bounds = array<i64: 2>, scalar_prefetch = 0 : i64, scratch_operands = 0 : i64, tpu.core_type = #tpu.core_type<tc>, window_params = [{transform_indices = @transform_0, window_bounds = array<i64: 8, 32>}, {pipeline_mode = #tpu.pipeline_mode<synchronous>, transform_indices = @transform_1, window_bounds = array<i64: 96, 32>}, {pipeline_mode = #tpu.pipeline_mode<synchronous>, transform_indices = @transform_2, window_bounds = array<i64: 1, 96>}, {pipeline_mode = #tpu.pipeline_mode<synchronous>, transform_indices = @transform_3, window_bounds = array<i64: 1, 96>}, {transform_indices = @transform_4, window_bounds = array<i64: 8, 96>}]} {
    %c0 = arith.constant 0 : index
    %c0_0 = arith.constant 0 : index
    %0 = vector.load %arg1[%c0, %c0_0] : memref<8x32xf32, #tpu.memory_space<vmem>>, vector<8x32xf32>
    %1 = arith.truncf %0 : vector<8x32xf32> to vector<8x32xbf16>
    %c0_1 = arith.constant 0 : index
    %c0_2 = arith.constant 0 : index
    %2 = vector.load %arg2[%c0_1, %c0_2] : memref<96x32xbf16, #tpu.memory_space<vmem>>, vector<96x32xbf16>
    %cst = arith.constant dense<0.000000e+00> : vector<8x96xf32>
    %3 = tpu.matmul %1, %2, %cst {dimension_numbers = #tpu.dot_dimension_numbers<[1], [1], [0], [0], [0, 0, 1, 0], [], []>} : vector<8x32xbf16>, vector<96x32xbf16>, vector<8x96xf32> -> vector<8x96xf32>
    %c0_3 = arith.constant 0 : index
    %c0_4 = arith.constant 0 : index
    %4 = vector.load %arg3[%c0_3, %c0_4] : memref<1x96xf32, #tpu.memory_space<vmem>>, vector<1x96xf32>
    %5 = vector.broadcast %4 : vector<1x96xf32> to vector<8x96xf32>
    %6 = arith.addf %3, %5 : vector<8x96xf32>
    %c0_5 = arith.constant 0 : index
    %c0_6 = arith.constant 0 : index
    %7 = vector.load %arg4[%c0_5, %c0_6] : memref<1x96xf32, #tpu.memory_space<vmem>>, vector<1x96xf32>
    %8 = vector.broadcast %7 : vector<1x96xf32> to vector<8x96xf32>
    %9 = arith.mulf %6, %8 : vector<8x96xf32>
    %c0_7 = arith.constant 0 : index
    %c0_8 = arith.constant 0 : index
    %10 = vector.load %arg5[%c0_7, %c0_8] : memref<8x96xf32, #tpu.memory_space<vmem>>, vector<8x96xf32>
    tpu.vector_store %arg5[%c0_7, %c0_8], %9 {strides = array<i32>} : memref<8x96xf32, #tpu.memory_space<vmem>>, vector<8x96xf32>,
    return
  }
  func.func @transform_0(%arg0: i32) -> (i32, i32) {
    %c0_i32 = arith.constant 0 : i32
    %c0_i32_0 = arith.constant 0 : i32
    return %arg0, %c0_i32 : i32, i32
  }
  func.func @transform_1(%arg0: i32) -> (i32, i32) {
    %c0_i32 = arith.constant 0 : i32
    %c0_i32_0 = arith.constant 0 : i32
    %c0_i32_1 = arith.constant 0 : i32
    return %c0_i32, %c0_i32_0 : i32, i32
  }
  func.func @transform_2(%arg0: i32) -> (i32, i32) {
    %c0_i32 = arith.constant 0 : i32
    %c0_i32_0 = arith.constant 0 : i32
    %c0_i32_1 = arith.constant 0 : i32
    return %c0_i32, %c0_i32_0 : i32, i32
  }
  func.func @transform_3(%arg0: i32) -> (i32, i32) {
    %c0_i32 = arith.constant 0 : i32
    %c0_i32_0 = arith.constant 0 : i32
    %c0_i32_1 = arith.constant 0 : i32
    return %c0_i32, %c0_i32_0 : i32, i32
  }
  func.func @transform_4(%arg0: i32) -> (i32, i32) {
    %c0_i32 = arith.constant 0 : i32
    %c0_i32_0 = arith.constant 0 : i32
    return %arg0, %c0_i32 : i32, i32
  }
}

module attributes {stable_mosaic.version = 11 : i64} {
  func.func @_self_attn_kernel(%arg0: i32, %arg1: memref<8x96xf32, #tpu.memory_space<vmem>>, %arg2: memref<8x32xf32, #tpu.memory_space<vmem>>) attributes {dimension_semantics = [#tpu.dimension_semantics<parallel>], iteration_bounds = array<i64: 2>, scalar_prefetch = 0 : i64, scratch_operands = 0 : i64, tpu.core_type = #tpu.core_type<tc>, window_params = [{transform_indices = @transform_0, window_bounds = array<i64: 8, 96>}, {transform_indices = @transform_1, window_bounds = array<i64: 8, 32>}]} {
    %c0 = arith.constant 0 : index
    %c0_0 = arith.constant 0 : index
    %0 = vector.load %arg1[%c0, %c0_0] : memref<8x96xf32, #tpu.memory_space<vmem>>, vector<8x96xf32>
    %1 = arith.truncf %0 : vector<8x96xf32> to vector<8x96xbf16>
    %2 = vector.extract_strided_slice %1 {offsets = [0, 0], sizes = [8, 32], strides = [1, 1]} : vector<8x96xbf16> to vector<8x32xbf16>
    %3 = vector.extract_strided_slice %1 {offsets = [0, 32], sizes = [8, 32], strides = [1, 1]} : vector<8x96xbf16> to vector<8x32xbf16>
    %4 = vector.extract_strided_slice %1 {offsets = [0, 64], sizes = [8, 32], strides = [1, 1]} : vector<8x96xbf16> to vector<8x32xbf16>
    %5 = vector.extract_strided_slice %2 {offsets = [0, 0], sizes = [8, 8], strides = [1, 1]} : vector<8x32xbf16> to vector<8x8xbf16>
    %6 = vector.extract_strided_slice %3 {offsets = [0, 0], sizes = [8, 8], strides = [1, 1]} : vector<8x32xbf16> to vector<8x8xbf16>
    %cst = arith.constant dense<0.000000e+00> : vector<8x8xf32>
    %7 = tpu.matmul %5, %6, %cst {dimension_numbers = #tpu.dot_dimension_numbers<[1], [1], [0], [0], [0, 0, 1, 0], [], []>} : vector<8x8xbf16>, vector<8x8xbf16>, vector<8x8xf32> -> vector<8x8xf32>
    %cst_1 = arith.constant dense<0xFF800000> : vector<8xf32>
    %8 = vector.multi_reduction <maximumf>, %7, %cst_1 [1] : vector<8x8xf32> to vector<8xf32>
    %9 = vector.shape_cast %8 : vector<8xf32> to vector<8x1xf32>
    %10 = vector.broadcast %9 : vector<8x1xf32> to vector<8x8xf32>
    %11 = arith.subf %7, %10 : vector<8x8xf32>
    %12 = math.exp %11 : vector<8x8xf32>
    %cst_2 = arith.constant dense<0.000000e+00> : vector<8xf32>
    %13 = vector.multi_reduction <add>, %12, %cst_2 [1] : vector<8x8xf32> to vector<8xf32>
    %14 = vector.shape_cast %13 : vector<8xf32> to vector<8x1xf32>
    %15 = tpu.reciprocal %14 {approx = true} : vector<8x1xf32> -> vector<8x1xf32>
    %16 = vector.broadcast %15 : vector<8x1xf32> to vector<8x8xf32>
    %17 = arith.mulf %12, %16 : vector<8x8xf32>
    %18 = arith.truncf %17 : vector<8x8xf32> to vector<8x8xbf16>
    %19 = vector.extract_strided_slice %4 {offsets = [0, 0], sizes = [8, 8], strides = [1, 1]} : vector<8x32xbf16> to vector<8x8xbf16>
    %cst_3 = arith.constant dense<0.000000e+00> : vector<8x8xf32>
    %20 = tpu.matmul %18, %19, %cst_3 {dimension_numbers = #tpu.dot_dimension_numbers<[1], [0], [0], [1], [0, 0, 1, 1], [], []>} : vector<8x8xbf16>, vector<8x8xbf16>, vector<8x8xf32> -> vector<8x8xf32>
    %21 = vector.extract_strided_slice %2 {offsets = [0, 8], sizes = [8, 8], strides = [1, 1]} : vector<8x32xbf16> to vector<8x8xbf16>
    %22 = vector.extract_strided_slice %3 {offsets = [0, 8], sizes = [8, 8], strides = [1, 1]} : vector<8x32xbf16> to vector<8x8xbf16>
    %cst_4 = arith.constant dense<0.000000e+00> : vector<8x8xf32>
    %23 = tpu.matmul %21, %22, %cst_4 {dimension_numbers = #tpu.dot_dimension_numbers<[1], [1], [0], [0], [0, 0, 1, 0], [], []>} : vector<8x8xbf16>, vector<8x8xbf16>, vector<8x8xf32> -> vector<8x8xf32>
    %cst_5 = arith.constant dense<0xFF800000> : vector<8xf32>
    %24 = vector.multi_reduction <maximumf>, %23, %cst_5 [1] : vector<8x8xf32> to vector<8xf32>
    %25 = vector.shape_cast %24 : vector<8xf32> to vector<8x1xf32>
    %26 = vector.broadcast %25 : vector<8x1xf32> to vector<8x8xf32>
    %27 = arith.subf %23, %26 : vector<8x8xf32>
    %28 = math.exp %27 : vector<8x8xf32>
    %cst_6 = arith.constant dense<0.000000e+00> : vector<8xf32>
    %29 = vector.multi_reduction <add>, %28, %cst_6 [1] : vector<8x8xf32> to vector<8xf32>
    %30 = vector.shape_cast %29 : vector<8xf32> to vector<8x1xf32>
    %31 = tpu.reciprocal %30 {approx = true} : vector<8x1xf32> -> vector<8x1xf32>
    %32 = vector.broadcast %31 : vector<8x1xf32> to vector<8x8xf32>
    %33 = arith.mulf %28, %32 : vector<8x8xf32>
    %34 = arith.truncf %33 : vector<8x8xf32> to vector<8x8xbf16>
    %35 = vector.extract_strided_slice %4 {offsets = [0, 8], sizes = [8, 8], strides = [1, 1]} : vector<8x32xbf16> to vector<8x8xbf16>
    %cst_7 = arith.constant dense<0.000000e+00> : vector<8x8xf32>
    %36 = tpu.matmul %34, %35, %cst_7 {dimension_numbers = #tpu.dot_dimension_numbers<[1], [0], [0], [1], [0, 0, 1, 1], [], []>} : vector<8x8xbf16>, vector<8x8xbf16>, vector<8x8xf32> -> vector<8x8xf32>
    %37 = vector.extract_strided_slice %2 {offsets = [0, 16], sizes = [8, 8], strides = [1, 1]} : vector<8x32xbf16> to vector<8x8xbf16>
    %38 = vector.extract_strided_slice %3 {offsets = [0, 16], sizes = [8, 8], strides = [1, 1]} : vector<8x32xbf16> to vector<8x8xbf16>
    %cst_8 = arith.constant dense<0.000000e+00> : vector<8x8xf32>
    %39 = tpu.matmul %37, %38, %cst_8 {dimension_numbers = #tpu.dot_dimension_numbers<[1], [1], [0], [0], [0, 0, 1, 0], [], []>} : vector<8x8xbf16>, vector<8x8xbf16>, vector<8x8xf32> -> vector<8x8xf32>
    %cst_9 = arith.constant dense<0xFF800000> : vector<8xf32>
    %40 = vector.multi_reduction <maximumf>, %39, %cst_9 [1] : vector<8x8xf32> to vector<8xf32>
    %41 = vector.shape_cast %40 : vector<8xf32> to vector<8x1xf32>
    %42 = vector.broadcast %41 : vector<8x1xf32> to vector<8x8xf32>
    %43 = arith.subf %39, %42 : vector<8x8xf32>
    %44 = math.exp %43 : vector<8x8xf32>
    %cst_10 = arith.constant dense<0.000000e+00> : vector<8xf32>
    %45 = vector.multi_reduction <add>, %44, %cst_10 [1] : vector<8x8xf32> to vector<8xf32>
    %46 = vector.shape_cast %45 : vector<8xf32> to vector<8x1xf32>
    %47 = tpu.reciprocal %46 {approx = true} : vector<8x1xf32> -> vector<8x1xf32>
    %48 = vector.broadcast %47 : vector<8x1xf32> to vector<8x8xf32>
    %49 = arith.mulf %44, %48 : vector<8x8xf32>
    %50 = arith.truncf %49 : vector<8x8xf32> to vector<8x8xbf16>
    %51 = vector.extract_strided_slice %4 {offsets = [0, 16], sizes = [8, 8], strides = [1, 1]} : vector<8x32xbf16> to vector<8x8xbf16>
    %cst_11 = arith.constant dense<0.000000e+00> : vector<8x8xf32>
    %52 = tpu.matmul %50, %51, %cst_11 {dimension_numbers = #tpu.dot_dimension_numbers<[1], [0], [0], [1], [0, 0, 1, 1], [], []>} : vector<8x8xbf16>, vector<8x8xbf16>, vector<8x8xf32> -> vector<8x8xf32>
    %53 = vector.extract_strided_slice %2 {offsets = [0, 24], sizes = [8, 8], strides = [1, 1]} : vector<8x32xbf16> to vector<8x8xbf16>
    %54 = vector.extract_strided_slice %3 {offsets = [0, 24], sizes = [8, 8], strides = [1, 1]} : vector<8x32xbf16> to vector<8x8xbf16>
    %cst_12 = arith.constant dense<0.000000e+00> : vector<8x8xf32>
    %55 = tpu.matmul %53, %54, %cst_12 {dimension_numbers = #tpu.dot_dimension_numbers<[1], [1], [0], [0], [0, 0, 1, 0], [], []>} : vector<8x8xbf16>, vector<8x8xbf16>, vector<8x8xf32> -> vector<8x8xf32>
    %cst_13 = arith.constant dense<0xFF800000> : vector<8xf32>
    %56 = vector.multi_reduction <maximumf>, %55, %cst_13 [1] : vector<8x8xf32> to vector<8xf32>
    %57 = vector.shape_cast %56 : vector<8xf32> to vector<8x1xf32>
    %58 = vector.broadcast %57 : vector<8x1xf32> to vector<8x8xf32>
    %59 = arith.subf %55, %58 : vector<8x8xf32>
    %60 = math.exp %59 : vector<8x8xf32>
    %cst_14 = arith.constant dense<0.000000e+00> : vector<8xf32>
    %61 = vector.multi_reduction <add>, %60, %cst_14 [1] : vector<8x8xf32> to vector<8xf32>
    %62 = vector.shape_cast %61 : vector<8xf32> to vector<8x1xf32>
    %63 = tpu.reciprocal %62 {approx = true} : vector<8x1xf32> -> vector<8x1xf32>
    %64 = vector.broadcast %63 : vector<8x1xf32> to vector<8x8xf32>
    %65 = arith.mulf %60, %64 : vector<8x8xf32>
    %66 = arith.truncf %65 : vector<8x8xf32> to vector<8x8xbf16>
    %67 = vector.extract_strided_slice %4 {offsets = [0, 24], sizes = [8, 8], strides = [1, 1]} : vector<8x32xbf16> to vector<8x8xbf16>
    %cst_15 = arith.constant dense<0.000000e+00> : vector<8x8xf32>
    %68 = tpu.matmul %66, %67, %cst_15 {dimension_numbers = #tpu.dot_dimension_numbers<[1], [0], [0], [1], [0, 0, 1, 1], [], []>} : vector<8x8xbf16>, vector<8x8xbf16>, vector<8x8xf32> -> vector<8x8xf32>
    %69 = tpu.concatenate %20, %36, %52, %68 in 1 : vector<8x8xf32>, vector<8x8xf32>, vector<8x8xf32>, vector<8x8xf32> -> vector<8x32xf32>
    %c0_16 = arith.constant 0 : index
    %c0_17 = arith.constant 0 : index
    %70 = vector.load %arg2[%c0_16, %c0_17] : memref<8x32xf32, #tpu.memory_space<vmem>>, vector<8x32xf32>
    tpu.vector_store %arg2[%c0_16, %c0_17], %69 {strides = array<i32>} : memref<8x32xf32, #tpu.memory_space<vmem>>, vector<8x32xf32>,
    return
  }
  func.func @transform_0(%arg0: i32) -> (i32, i32) {
    %c0_i32 = arith.constant 0 : i32
    %c0_i32_0 = arith.constant 0 : i32
    return %arg0, %c0_i32 : i32, i32
  }
  func.func @transform_1(%arg0: i32) -> (i32, i32) {
    %c0_i32 = arith.constant 0 : i32
    %c0_i32_0 = arith.constant 0 : i32
    return %arg0, %c0_i32 : i32, i32
  }
}

module attributes {stable_mosaic.version = 11 : i64} {
  func.func @_matmul_residual_ln_kernel(%arg0: i32, %arg1: memref<8x32xf32, #tpu.memory_space<vmem>>, %arg2: memref<8x32xf32, #tpu.memory_space<vmem>>, %arg3: memref<32x32xbf16, #tpu.memory_space<vmem>>, %arg4: memref<1x32xf32, #tpu.memory_space<vmem>>, %arg5: memref<1x32xf32, #tpu.memory_space<vmem>>, %arg6: memref<1x32xf32, #tpu.memory_space<vmem>>, %arg7: memref<8x32xf32, #tpu.memory_space<vmem>>) attributes {dimension_semantics = [#tpu.dimension_semantics<parallel>], iteration_bounds = array<i64: 2>, scalar_prefetch = 0 : i64, scratch_operands = 0 : i64, tpu.core_type = #tpu.core_type<tc>, window_params = [{transform_indices = @transform_0, window_bounds = array<i64: 8, 32>}, {transform_indices = @transform_1, window_bounds = array<i64: 8, 32>}, {pipeline_mode = #tpu.pipeline_mode<synchronous>, transform_indices = @transform_2, window_bounds = array<i64: 32, 32>}, {pipeline_mode = #tpu.pipeline_mode<synchronous>, transform_indices = @transform_3, window_bounds = array<i64: 1, 32>}, {pipeline_mode = #tpu.pipeline_mode<synchronous>, transform_indices = @transform_4, window_bounds = array<i64: 1, 32>}, {pipeline_mode = #tpu.pipeline_mode<synchronous>, transform_indices = @transform_5, window_bounds = array<i64: 1, 32>}, {transform_indices = @transform_6, window_bounds = array<i64: 8, 32>}]} {
    %c0 = arith.constant 0 : index
    %c0_0 = arith.constant 0 : index
    %0 = vector.load %arg1[%c0, %c0_0] : memref<8x32xf32, #tpu.memory_space<vmem>>, vector<8x32xf32>
    %1 = arith.truncf %0 : vector<8x32xf32> to vector<8x32xbf16>
    %c0_1 = arith.constant 0 : index
    %c0_2 = arith.constant 0 : index
    %2 = vector.load %arg3[%c0_1, %c0_2] : memref<32x32xbf16, #tpu.memory_space<vmem>>, vector<32x32xbf16>
    %cst = arith.constant dense<0.000000e+00> : vector<8x32xf32>
    %3 = tpu.matmul %1, %2, %cst {dimension_numbers = #tpu.dot_dimension_numbers<[1], [1], [0], [0], [0, 0, 1, 0], [], []>} : vector<8x32xbf16>, vector<32x32xbf16>, vector<8x32xf32> -> vector<8x32xf32>
    %c0_3 = arith.constant 0 : index
    %c0_4 = arith.constant 0 : index
    %4 = vector.load %arg4[%c0_3, %c0_4] : memref<1x32xf32, #tpu.memory_space<vmem>>, vector<1x32xf32>
    %5 = vector.broadcast %4 : vector<1x32xf32> to vector<8x32xf32>
    %6 = arith.addf %3, %5 : vector<8x32xf32>
    %c0_5 = arith.constant 0 : index
    %c0_6 = arith.constant 0 : index
    %7 = vector.load %arg2[%c0_5, %c0_6] : memref<8x32xf32, #tpu.memory_space<vmem>>, vector<8x32xf32>
    %8 = arith.addf %7, %6 : vector<8x32xf32>
    %cst_7 = arith.constant dense<0.000000e+00> : vector<8xf32>
    %9 = vector.multi_reduction <add>, %8, %cst_7 [1] : vector<8x32xf32> to vector<8xf32>
    %10 = vector.shape_cast %9 : vector<8xf32> to vector<8x1xf32>
    %cst_8 = arith.constant 3.200000e+01 : f32
    %11 = vector.broadcast %cst_8 : f32 to vector<8x1xf32>
    %12 = arith.divf %10, %11 : vector<8x1xf32>
    %13 = vector.broadcast %12 : vector<8x1xf32> to vector<8x32xf32>
    %14 = arith.subf %8, %13 : vector<8x32xf32>
    %15 = vector.broadcast %12 : vector<8x1xf32> to vector<8x32xf32>
    %16 = arith.subf %8, %15 : vector<8x32xf32>
    %17 = arith.mulf %14, %16 : vector<8x32xf32>
    %cst_9 = arith.constant dense<0.000000e+00> : vector<8xf32>
    %18 = vector.multi_reduction <add>, %17, %cst_9 [1] : vector<8x32xf32> to vector<8xf32>
    %19 = vector.shape_cast %18 : vector<8xf32> to vector<8x1xf32>
    %cst_10 = arith.constant 3.200000e+01 : f32
    %20 = vector.broadcast %cst_10 : f32 to vector<8x1xf32>
    %21 = arith.divf %19, %20 : vector<8x1xf32>
    %22 = vector.broadcast %12 : vector<8x1xf32> to vector<8x32xf32>
    %23 = arith.subf %8, %22 : vector<8x32xf32>
    %cst_11 = arith.constant 9.99999974E-6 : f32
    %24 = vector.broadcast %cst_11 : f32 to vector<8x1xf32>
    %25 = arith.addf %21, %24 : vector<8x1xf32>
    %26 = math.rsqrt %25 : vector<8x1xf32>
    %27 = vector.broadcast %26 : vector<8x1xf32> to vector<8x32xf32>
    %28 = arith.mulf %23, %27 : vector<8x32xf32>
    %c0_12 = arith.constant 0 : index
    %c0_13 = arith.constant 0 : index
    %29 = vector.load %arg5[%c0_12, %c0_13] : memref<1x32xf32, #tpu.memory_space<vmem>>, vector<1x32xf32>
    %30 = vector.broadcast %29 : vector<1x32xf32> to vector<8x32xf32>
    %31 = arith.mulf %28, %30 : vector<8x32xf32>
    %c0_14 = arith.constant 0 : index
    %c0_15 = arith.constant 0 : index
    %32 = vector.load %arg6[%c0_14, %c0_15] : memref<1x32xf32, #tpu.memory_space<vmem>>, vector<1x32xf32>
    %33 = vector.broadcast %32 : vector<1x32xf32> to vector<8x32xf32>
    %34 = arith.addf %31, %33 : vector<8x32xf32>
    %c0_16 = arith.constant 0 : index
    %c0_17 = arith.constant 0 : index
    %35 = vector.load %arg7[%c0_16, %c0_17] : memref<8x32xf32, #tpu.memory_space<vmem>>, vector<8x32xf32>
    tpu.vector_store %arg7[%c0_16, %c0_17], %34 {strides = array<i32>} : memref<8x32xf32, #tpu.memory_space<vmem>>, vector<8x32xf32>,
    return
  }
  func.func @transform_0(%arg0: i32) -> (i32, i32) {
    %c0_i32 = arith.constant 0 : i32
    %c0_i32_0 = arith.constant 0 : i32
    return %arg0, %c0_i32 : i32, i32
  }
  func.func @transform_1(%arg0: i32) -> (i32, i32) {
    %c0_i32 = arith.constant 0 : i32
    %c0_i32_0 = arith.constant 0 : i32
    return %arg0, %c0_i32 : i32, i32
  }
  func.func @transform_2(%arg0: i32) -> (i32, i32) {
    %c0_i32 = arith.constant 0 : i32
    %c0_i32_0 = arith.constant 0 : i32
    %c0_i32_1 = arith.constant 0 : i32
    return %c0_i32, %c0_i32_0 : i32, i32
  }
  func.func @transform_3(%arg0: i32) -> (i32, i32) {
    %c0_i32 = arith.constant 0 : i32
    %c0_i32_0 = arith.constant 0 : i32
    %c0_i32_1 = arith.constant 0 : i32
    return %c0_i32, %c0_i32_0 : i32, i32
  }
  func.func @transform_4(%arg0: i32) -> (i32, i32) {
    %c0_i32 = arith.constant 0 : i32
    %c0_i32_0 = arith.constant 0 : i32
    %c0_i32_1 = arith.constant 0 : i32
    return %c0_i32, %c0_i32_0 : i32, i32
  }
  func.func @transform_5(%arg0: i32) -> (i32, i32) {
    %c0_i32 = arith.constant 0 : i32
    %c0_i32_0 = arith.constant 0 : i32
    %c0_i32_1 = arith.constant 0 : i32
    return %c0_i32, %c0_i32_0 : i32, i32
  }
  func.func @transform_6(%arg0: i32) -> (i32, i32) {
    %c0_i32 = arith.constant 0 : i32
    %c0_i32_0 = arith.constant 0 : i32
    return %arg0, %c0_i32 : i32, i32
  }
}

module attributes {stable_mosaic.version = 11 : i64} {
  func.func @_proj_kernel(%arg0: i32, %arg1: memref<8x32xf32, #tpu.memory_space<vmem>>, %arg2: memref<32x32xbf16, #tpu.memory_space<vmem>>, %arg3: memref<1x32xf32, #tpu.memory_space<vmem>>, %arg4: memref<1x32xf32, #tpu.memory_space<vmem>>, %arg5: memref<8x32xf32, #tpu.memory_space<vmem>>) attributes {dimension_semantics = [#tpu.dimension_semantics<parallel>], iteration_bounds = array<i64: 2>, scalar_prefetch = 0 : i64, scratch_operands = 0 : i64, tpu.core_type = #tpu.core_type<tc>, window_params = [{transform_indices = @transform_0, window_bounds = array<i64: 8, 32>}, {pipeline_mode = #tpu.pipeline_mode<synchronous>, transform_indices = @transform_1, window_bounds = array<i64: 32, 32>}, {pipeline_mode = #tpu.pipeline_mode<synchronous>, transform_indices = @transform_2, window_bounds = array<i64: 1, 32>}, {pipeline_mode = #tpu.pipeline_mode<synchronous>, transform_indices = @transform_3, window_bounds = array<i64: 1, 32>}, {transform_indices = @transform_4, window_bounds = array<i64: 8, 32>}]} {
    %c0 = arith.constant 0 : index
    %c0_0 = arith.constant 0 : index
    %0 = vector.load %arg1[%c0, %c0_0] : memref<8x32xf32, #tpu.memory_space<vmem>>, vector<8x32xf32>
    %1 = arith.truncf %0 : vector<8x32xf32> to vector<8x32xbf16>
    %c0_1 = arith.constant 0 : index
    %c0_2 = arith.constant 0 : index
    %2 = vector.load %arg2[%c0_1, %c0_2] : memref<32x32xbf16, #tpu.memory_space<vmem>>, vector<32x32xbf16>
    %cst = arith.constant dense<0.000000e+00> : vector<8x32xf32>
    %3 = tpu.matmul %1, %2, %cst {dimension_numbers = #tpu.dot_dimension_numbers<[1], [1], [0], [0], [0, 0, 1, 0], [], []>} : vector<8x32xbf16>, vector<32x32xbf16>, vector<8x32xf32> -> vector<8x32xf32>
    %c0_3 = arith.constant 0 : index
    %c0_4 = arith.constant 0 : index
    %4 = vector.load %arg3[%c0_3, %c0_4] : memref<1x32xf32, #tpu.memory_space<vmem>>, vector<1x32xf32>
    %5 = vector.broadcast %4 : vector<1x32xf32> to vector<8x32xf32>
    %6 = arith.addf %3, %5 : vector<8x32xf32>
    %c0_5 = arith.constant 0 : index
    %c0_6 = arith.constant 0 : index
    %7 = vector.load %arg4[%c0_5, %c0_6] : memref<1x32xf32, #tpu.memory_space<vmem>>, vector<1x32xf32>
    %8 = vector.broadcast %7 : vector<1x32xf32> to vector<8x32xf32>
    %9 = arith.mulf %6, %8 : vector<8x32xf32>
    %c0_7 = arith.constant 0 : index
    %c0_8 = arith.constant 0 : index
    %10 = vector.load %arg5[%c0_7, %c0_8] : memref<8x32xf32, #tpu.memory_space<vmem>>, vector<8x32xf32>
    tpu.vector_store %arg5[%c0_7, %c0_8], %9 {strides = array<i32>} : memref<8x32xf32, #tpu.memory_space<vmem>>, vector<8x32xf32>,
    return
  }
  func.func @transform_0(%arg0: i32) -> (i32, i32) {
    %c0_i32 = arith.constant 0 : i32
    %c0_i32_0 = arith.constant 0 : i32
    return %arg0, %c0_i32 : i32, i32
  }
  func.func @transform_1(%arg0: i32) -> (i32, i32) {
    %c0_i32 = arith.constant 0 : i32
    %c0_i32_0 = arith.constant 0 : i32
    %c0_i32_1 = arith.constant 0 : i32
    return %c0_i32, %c0_i32_0 : i32, i32
  }
  func.func @transform_2(%arg0: i32) -> (i32, i32) {
    %c0_i32 = arith.constant 0 : i32
    %c0_i32_0 = arith.constant 0 : i32
    %c0_i32_1 = arith.constant 0 : i32
    return %c0_i32, %c0_i32_0 : i32, i32
  }
  func.func @transform_3(%arg0: i32) -> (i32, i32) {
    %c0_i32 = arith.constant 0 : i32
    %c0_i32_0 = arith.constant 0 : i32
    %c0_i32_1 = arith.constant 0 : i32
    return %c0_i32, %c0_i32_0 : i32, i32
  }
  func.func @transform_4(%arg0: i32) -> (i32, i32) {
    %c0_i32 = arith.constant 0 : i32
    %c0_i32_0 = arith.constant 0 : i32
    return %arg0, %c0_i32 : i32, i32
  }
}

module attributes {stable_mosaic.version = 11 : i64} {
  func.func @_proj_kernel(%arg0: i32, %arg1: memref<8x32xf32, #tpu.memory_space<vmem>>, %arg2: memref<64x32xbf16, #tpu.memory_space<vmem>>, %arg3: memref<1x64xf32, #tpu.memory_space<vmem>>, %arg4: memref<1x64xf32, #tpu.memory_space<vmem>>, %arg5: memref<8x64xf32, #tpu.memory_space<vmem>>) attributes {dimension_semantics = [#tpu.dimension_semantics<parallel>], iteration_bounds = array<i64: 2>, scalar_prefetch = 0 : i64, scratch_operands = 0 : i64, tpu.core_type = #tpu.core_type<tc>, window_params = [{transform_indices = @transform_0, window_bounds = array<i64: 8, 32>}, {pipeline_mode = #tpu.pipeline_mode<synchronous>, transform_indices = @transform_1, window_bounds = array<i64: 64, 32>}, {pipeline_mode = #tpu.pipeline_mode<synchronous>, transform_indices = @transform_2, window_bounds = array<i64: 1, 64>}, {pipeline_mode = #tpu.pipeline_mode<synchronous>, transform_indices = @transform_3, window_bounds = array<i64: 1, 64>}, {transform_indices = @transform_4, window_bounds = array<i64: 8, 64>}]} {
    %c0 = arith.constant 0 : index
    %c0_0 = arith.constant 0 : index
    %0 = vector.load %arg1[%c0, %c0_0] : memref<8x32xf32, #tpu.memory_space<vmem>>, vector<8x32xf32>
    %1 = arith.truncf %0 : vector<8x32xf32> to vector<8x32xbf16>
    %c0_1 = arith.constant 0 : index
    %c0_2 = arith.constant 0 : index
    %2 = vector.load %arg2[%c0_1, %c0_2] : memref<64x32xbf16, #tpu.memory_space<vmem>>, vector<64x32xbf16>
    %cst = arith.constant dense<0.000000e+00> : vector<8x64xf32>
    %3 = tpu.matmul %1, %2, %cst {dimension_numbers = #tpu.dot_dimension_numbers<[1], [1], [0], [0], [0, 0, 1, 0], [], []>} : vector<8x32xbf16>, vector<64x32xbf16>, vector<8x64xf32> -> vector<8x64xf32>
    %c0_3 = arith.constant 0 : index
    %c0_4 = arith.constant 0 : index
    %4 = vector.load %arg3[%c0_3, %c0_4] : memref<1x64xf32, #tpu.memory_space<vmem>>, vector<1x64xf32>
    %5 = vector.broadcast %4 : vector<1x64xf32> to vector<8x64xf32>
    %6 = arith.addf %3, %5 : vector<8x64xf32>
    %c0_5 = arith.constant 0 : index
    %c0_6 = arith.constant 0 : index
    %7 = vector.load %arg4[%c0_5, %c0_6] : memref<1x64xf32, #tpu.memory_space<vmem>>, vector<1x64xf32>
    %8 = vector.broadcast %7 : vector<1x64xf32> to vector<8x64xf32>
    %9 = arith.mulf %6, %8 : vector<8x64xf32>
    %c0_7 = arith.constant 0 : index
    %c0_8 = arith.constant 0 : index
    %10 = vector.load %arg5[%c0_7, %c0_8] : memref<8x64xf32, #tpu.memory_space<vmem>>, vector<8x64xf32>
    tpu.vector_store %arg5[%c0_7, %c0_8], %9 {strides = array<i32>} : memref<8x64xf32, #tpu.memory_space<vmem>>, vector<8x64xf32>,
    return
  }
  func.func @transform_0(%arg0: i32) -> (i32, i32) {
    %c0_i32 = arith.constant 0 : i32
    %c0_i32_0 = arith.constant 0 : i32
    return %arg0, %c0_i32 : i32, i32
  }
  func.func @transform_1(%arg0: i32) -> (i32, i32) {
    %c0_i32 = arith.constant 0 : i32
    %c0_i32_0 = arith.constant 0 : i32
    %c0_i32_1 = arith.constant 0 : i32
    return %c0_i32, %c0_i32_0 : i32, i32
  }
  func.func @transform_2(%arg0: i32) -> (i32, i32) {
    %c0_i32 = arith.constant 0 : i32
    %c0_i32_0 = arith.constant 0 : i32
    %c0_i32_1 = arith.constant 0 : i32
    return %c0_i32, %c0_i32_0 : i32, i32
  }
  func.func @transform_3(%arg0: i32) -> (i32, i32) {
    %c0_i32 = arith.constant 0 : i32
    %c0_i32_0 = arith.constant 0 : i32
    %c0_i32_1 = arith.constant 0 : i32
    return %c0_i32, %c0_i32_0 : i32, i32
  }
  func.func @transform_4(%arg0: i32) -> (i32, i32) {
    %c0_i32 = arith.constant 0 : i32
    %c0_i32_0 = arith.constant 0 : i32
    return %arg0, %c0_i32 : i32, i32
  }
}

module attributes {stable_mosaic.version = 11 : i64} {
  func.func @_enc_attn_kernel(%arg0: i32, %arg1: memref<8x32xf32, #tpu.memory_space<vmem>>, %arg2: memref<8x64xf32, #tpu.memory_space<vmem>>, %arg3: memref<1x1x8xf32, #tpu.memory_space<vmem>>, %arg4: memref<8x32xf32, #tpu.memory_space<vmem>>, %arg5: memref<1x8x8xf32, #tpu.memory_space<vmem>>) attributes {dimension_semantics = [#tpu.dimension_semantics<parallel>], iteration_bounds = array<i64: 2>, scalar_prefetch = 0 : i64, scratch_operands = 0 : i64, tpu.core_type = #tpu.core_type<tc>, window_params = [{transform_indices = @transform_0, window_bounds = array<i64: 8, 32>}, {transform_indices = @transform_1, window_bounds = array<i64: 8, 64>}, {transform_indices = @transform_2, window_bounds = array<i64: 1, 1, 8>}, {transform_indices = @transform_3, window_bounds = array<i64: 8, 32>}, {transform_indices = @transform_4, window_bounds = array<i64: 1, 8, 8>}]} {
    %c0 = arith.constant 0 : index
    %c0_0 = arith.constant 0 : index
    %0 = vector.load %arg1[%c0, %c0_0] : memref<8x32xf32, #tpu.memory_space<vmem>>, vector<8x32xf32>
    %1 = arith.truncf %0 : vector<8x32xf32> to vector<8x32xbf16>
    %c0_1 = arith.constant 0 : index
    %c0_2 = arith.constant 0 : index
    %2 = vector.load %arg2[%c0_1, %c0_2] : memref<8x64xf32, #tpu.memory_space<vmem>>, vector<8x64xf32>
    %3 = arith.truncf %2 : vector<8x64xf32> to vector<8x64xbf16>
    %4 = vector.extract_strided_slice %3 {offsets = [0, 0], sizes = [8, 32], strides = [1, 1]} : vector<8x64xbf16> to vector<8x32xbf16>
    %5 = vector.extract_strided_slice %3 {offsets = [0, 32], sizes = [8, 32], strides = [1, 1]} : vector<8x64xbf16> to vector<8x32xbf16>
    %c0_3 = arith.constant 0 : index
    %c0_4 = arith.constant 0 : index
    %c0_5 = arith.constant 0 : index
    %6 = vector.load %arg3[%c0_3, %c0_4, %c0_5] : memref<1x1x8xf32, #tpu.memory_space<vmem>>, vector<1x1x8xf32>
    %7 = vector.shape_cast %6 : vector<1x1x8xf32> to vector<1x8xf32>
    %cst = arith.constant 0.000000e+00 : f32
    %8 = vector.broadcast %cst : f32 to vector<8x8xf32>
    %9 = vector.extract_strided_slice %1 {offsets = [0, 0], sizes = [8, 8], strides = [1, 1]} : vector<8x32xbf16> to vector<8x8xbf16>
    %10 = vector.extract_strided_slice %4 {offsets = [0, 0], sizes = [8, 8], strides = [1, 1]} : vector<8x32xbf16> to vector<8x8xbf16>
    %cst_6 = arith.constant dense<0.000000e+00> : vector<8x8xf32>
    %11 = tpu.matmul %9, %10, %cst_6 {dimension_numbers = #tpu.dot_dimension_numbers<[1], [1], [0], [0], [0, 0, 1, 0], [], []>} : vector<8x8xbf16>, vector<8x8xbf16>, vector<8x8xf32> -> vector<8x8xf32>
    %12 = vector.broadcast %7 : vector<1x8xf32> to vector<8x8xf32>
    %13 = arith.addf %11, %12 : vector<8x8xf32>
    %cst_7 = arith.constant dense<0xFF800000> : vector<8xf32>
    %14 = vector.multi_reduction <maximumf>, %13, %cst_7 [1] : vector<8x8xf32> to vector<8xf32>
    %15 = vector.shape_cast %14 : vector<8xf32> to vector<8x1xf32>
    %16 = vector.broadcast %15 : vector<8x1xf32> to vector<8x8xf32>
    %17 = arith.subf %13, %16 : vector<8x8xf32>
    %18 = math.exp %17 : vector<8x8xf32>
    %cst_8 = arith.constant dense<0.000000e+00> : vector<8xf32>
    %19 = vector.multi_reduction <add>, %18, %cst_8 [1] : vector<8x8xf32> to vector<8xf32>
    %20 = vector.shape_cast %19 : vector<8xf32> to vector<8x1xf32>
    %21 = tpu.reciprocal %20 {approx = true} : vector<8x1xf32> -> vector<8x1xf32>
    %22 = vector.broadcast %21 : vector<8x1xf32> to vector<8x8xf32>
    %23 = arith.mulf %18, %22 : vector<8x8xf32>
    %24 = arith.truncf %23 : vector<8x8xf32> to vector<8x8xbf16>
    %25 = vector.extract_strided_slice %5 {offsets = [0, 0], sizes = [8, 8], strides = [1, 1]} : vector<8x32xbf16> to vector<8x8xbf16>
    %cst_9 = arith.constant dense<0.000000e+00> : vector<8x8xf32>
    %26 = tpu.matmul %24, %25, %cst_9 {dimension_numbers = #tpu.dot_dimension_numbers<[1], [0], [0], [1], [0, 0, 1, 1], [], []>} : vector<8x8xbf16>, vector<8x8xbf16>, vector<8x8xf32> -> vector<8x8xf32>
    %27 = arith.addf %8, %23 : vector<8x8xf32>
    %28 = vector.extract_strided_slice %1 {offsets = [0, 8], sizes = [8, 8], strides = [1, 1]} : vector<8x32xbf16> to vector<8x8xbf16>
    %29 = vector.extract_strided_slice %4 {offsets = [0, 8], sizes = [8, 8], strides = [1, 1]} : vector<8x32xbf16> to vector<8x8xbf16>
    %cst_10 = arith.constant dense<0.000000e+00> : vector<8x8xf32>
    %30 = tpu.matmul %28, %29, %cst_10 {dimension_numbers = #tpu.dot_dimension_numbers<[1], [1], [0], [0], [0, 0, 1, 0], [], []>} : vector<8x8xbf16>, vector<8x8xbf16>, vector<8x8xf32> -> vector<8x8xf32>
    %31 = vector.broadcast %7 : vector<1x8xf32> to vector<8x8xf32>
    %32 = arith.addf %30, %31 : vector<8x8xf32>
    %cst_11 = arith.constant dense<0xFF800000> : vector<8xf32>
    %33 = vector.multi_reduction <maximumf>, %32, %cst_11 [1] : vector<8x8xf32> to vector<8xf32>
    %34 = vector.shape_cast %33 : vector<8xf32> to vector<8x1xf32>
    %35 = vector.broadcast %34 : vector<8x1xf32> to vector<8x8xf32>
    %36 = arith.subf %32, %35 : vector<8x8xf32>
    %37 = math.exp %36 : vector<8x8xf32>
    %cst_12 = arith.constant dense<0.000000e+00> : vector<8xf32>
    %38 = vector.multi_reduction <add>, %37, %cst_12 [1] : vector<8x8xf32> to vector<8xf32>
    %39 = vector.shape_cast %38 : vector<8xf32> to vector<8x1xf32>
    %40 = tpu.reciprocal %39 {approx = true} : vector<8x1xf32> -> vector<8x1xf32>
    %41 = vector.broadcast %40 : vector<8x1xf32> to vector<8x8xf32>
    %42 = arith.mulf %37, %41 : vector<8x8xf32>
    %43 = arith.truncf %42 : vector<8x8xf32> to vector<8x8xbf16>
    %44 = vector.extract_strided_slice %5 {offsets = [0, 8], sizes = [8, 8], strides = [1, 1]} : vector<8x32xbf16> to vector<8x8xbf16>
    %cst_13 = arith.constant dense<0.000000e+00> : vector<8x8xf32>
    %45 = tpu.matmul %43, %44, %cst_13 {dimension_numbers = #tpu.dot_dimension_numbers<[1], [0], [0], [1], [0, 0, 1, 1], [], []>} : vector<8x8xbf16>, vector<8x8xbf16>, vector<8x8xf32> -> vector<8x8xf32>
    %46 = arith.addf %27, %42 : vector<8x8xf32>
    %47 = vector.extract_strided_slice %1 {offsets = [0, 16], sizes = [8, 8], strides = [1, 1]} : vector<8x32xbf16> to vector<8x8xbf16>
    %48 = vector.extract_strided_slice %4 {offsets = [0, 16], sizes = [8, 8], strides = [1, 1]} : vector<8x32xbf16> to vector<8x8xbf16>
    %cst_14 = arith.constant dense<0.000000e+00> : vector<8x8xf32>
    %49 = tpu.matmul %47, %48, %cst_14 {dimension_numbers = #tpu.dot_dimension_numbers<[1], [1], [0], [0], [0, 0, 1, 0], [], []>} : vector<8x8xbf16>, vector<8x8xbf16>, vector<8x8xf32> -> vector<8x8xf32>
    %50 = vector.broadcast %7 : vector<1x8xf32> to vector<8x8xf32>
    %51 = arith.addf %49, %50 : vector<8x8xf32>
    %cst_15 = arith.constant dense<0xFF800000> : vector<8xf32>
    %52 = vector.multi_reduction <maximumf>, %51, %cst_15 [1] : vector<8x8xf32> to vector<8xf32>
    %53 = vector.shape_cast %52 : vector<8xf32> to vector<8x1xf32>
    %54 = vector.broadcast %53 : vector<8x1xf32> to vector<8x8xf32>
    %55 = arith.subf %51, %54 : vector<8x8xf32>
    %56 = math.exp %55 : vector<8x8xf32>
    %cst_16 = arith.constant dense<0.000000e+00> : vector<8xf32>
    %57 = vector.multi_reduction <add>, %56, %cst_16 [1] : vector<8x8xf32> to vector<8xf32>
    %58 = vector.shape_cast %57 : vector<8xf32> to vector<8x1xf32>
    %59 = tpu.reciprocal %58 {approx = true} : vector<8x1xf32> -> vector<8x1xf32>
    %60 = vector.broadcast %59 : vector<8x1xf32> to vector<8x8xf32>
    %61 = arith.mulf %56, %60 : vector<8x8xf32>
    %62 = arith.truncf %61 : vector<8x8xf32> to vector<8x8xbf16>
    %63 = vector.extract_strided_slice %5 {offsets = [0, 16], sizes = [8, 8], strides = [1, 1]} : vector<8x32xbf16> to vector<8x8xbf16>
    %cst_17 = arith.constant dense<0.000000e+00> : vector<8x8xf32>
    %64 = tpu.matmul %62, %63, %cst_17 {dimension_numbers = #tpu.dot_dimension_numbers<[1], [0], [0], [1], [0, 0, 1, 1], [], []>} : vector<8x8xbf16>, vector<8x8xbf16>, vector<8x8xf32> -> vector<8x8xf32>
    %65 = arith.addf %46, %61 : vector<8x8xf32>
    %66 = vector.extract_strided_slice %1 {offsets = [0, 24], sizes = [8, 8], strides = [1, 1]} : vector<8x32xbf16> to vector<8x8xbf16>
    %67 = vector.extract_strided_slice %4 {offsets = [0, 24], sizes = [8, 8], strides = [1, 1]} : vector<8x32xbf16> to vector<8x8xbf16>
    %cst_18 = arith.constant dense<0.000000e+00> : vector<8x8xf32>
    %68 = tpu.matmul %66, %67, %cst_18 {dimension_numbers = #tpu.dot_dimension_numbers<[1], [1], [0], [0], [0, 0, 1, 0], [], []>} : vector<8x8xbf16>, vector<8x8xbf16>, vector<8x8xf32> -> vector<8x8xf32>
    %69 = vector.broadcast %7 : vector<1x8xf32> to vector<8x8xf32>
    %70 = arith.addf %68, %69 : vector<8x8xf32>
    %cst_19 = arith.constant dense<0xFF800000> : vector<8xf32>
    %71 = vector.multi_reduction <maximumf>, %70, %cst_19 [1] : vector<8x8xf32> to vector<8xf32>
    %72 = vector.shape_cast %71 : vector<8xf32> to vector<8x1xf32>
    %73 = vector.broadcast %72 : vector<8x1xf32> to vector<8x8xf32>
    %74 = arith.subf %70, %73 : vector<8x8xf32>
    %75 = math.exp %74 : vector<8x8xf32>
    %cst_20 = arith.constant dense<0.000000e+00> : vector<8xf32>
    %76 = vector.multi_reduction <add>, %75, %cst_20 [1] : vector<8x8xf32> to vector<8xf32>
    %77 = vector.shape_cast %76 : vector<8xf32> to vector<8x1xf32>
    %78 = tpu.reciprocal %77 {approx = true} : vector<8x1xf32> -> vector<8x1xf32>
    %79 = vector.broadcast %78 : vector<8x1xf32> to vector<8x8xf32>
    %80 = arith.mulf %75, %79 : vector<8x8xf32>
    %81 = arith.truncf %80 : vector<8x8xf32> to vector<8x8xbf16>
    %82 = vector.extract_strided_slice %5 {offsets = [0, 24], sizes = [8, 8], strides = [1, 1]} : vector<8x32xbf16> to vector<8x8xbf16>
    %cst_21 = arith.constant dense<0.000000e+00> : vector<8x8xf32>
    %83 = tpu.matmul %81, %82, %cst_21 {dimension_numbers = #tpu.dot_dimension_numbers<[1], [0], [0], [1], [0, 0, 1, 1], [], []>} : vector<8x8xbf16>, vector<8x8xbf16>, vector<8x8xf32> -> vector<8x8xf32>
    %84 = arith.addf %65, %80 : vector<8x8xf32>
    %85 = tpu.concatenate %26, %45, %64, %83 in 1 : vector<8x8xf32>, vector<8x8xf32>, vector<8x8xf32>, vector<8x8xf32> -> vector<8x32xf32>
    %c0_22 = arith.constant 0 : index
    %c0_23 = arith.constant 0 : index
    %86 = vector.load %arg4[%c0_22, %c0_23] : memref<8x32xf32, #tpu.memory_space<vmem>>, vector<8x32xf32>
    tpu.vector_store %arg4[%c0_22, %c0_23], %85 {strides = array<i32>} : memref<8x32xf32, #tpu.memory_space<vmem>>, vector<8x32xf32>,
    %cst_24 = arith.constant 2.500000e-01 : f32
    %87 = vector.broadcast %cst_24 : f32 to vector<8x8xf32>
    %88 = arith.mulf %84, %87 : vector<8x8xf32>
    %c0_25 = arith.constant 0 : index
    %c0_26 = arith.constant 0 : index
    %c0_27 = arith.constant 0 : index
    %89 = vector.load %arg5[%c0_25, %c0_26, %c0_27] : memref<1x8x8xf32, #tpu.memory_space<vmem>>, vector<1x8x8xf32>
    %90 = vector.shape_cast %89 : vector<1x8x8xf32> to vector<8x8xf32>
    %91 = vector.shape_cast %88 : vector<8x8xf32> to vector<1x8x8xf32>
    tpu.vector_store %arg5[%c0_25, %c0_26, %c0_27], %91 {strides = array<i32>} : memref<1x8x8xf32, #tpu.memory_space<vmem>>, vector<1x8x8xf32>,
    return
  }
  func.func @transform_0(%arg0: i32) -> (i32, i32) {
    %c0_i32 = arith.constant 0 : i32
    %c0_i32_0 = arith.constant 0 : i32
    return %arg0, %c0_i32 : i32, i32
  }
  func.func @transform_1(%arg0: i32) -> (i32, i32) {
    %c0_i32 = arith.constant 0 : i32
    %c0_i32_0 = arith.constant 0 : i32
    return %arg0, %c0_i32 : i32, i32
  }
  func.func @transform_2(%arg0: i32) -> (i32, i32, i32) {
    %c0_i32 = arith.constant 0 : i32
    %c0_i32_0 = arith.constant 0 : i32
    %c0_i32_1 = arith.constant 0 : i32
    return %arg0, %c0_i32, %c0_i32_0 : i32, i32, i32
  }
  func.func @transform_3(%arg0: i32) -> (i32, i32) {
    %c0_i32 = arith.constant 0 : i32
    %c0_i32_0 = arith.constant 0 : i32
    return %arg0, %c0_i32 : i32, i32
  }
  func.func @transform_4(%arg0: i32) -> (i32, i32, i32) {
    %c0_i32 = arith.constant 0 : i32
    %c0_i32_0 = arith.constant 0 : i32
    %c0_i32_1 = arith.constant 0 : i32
    return %arg0, %c0_i32, %c0_i32_0 : i32, i32, i32
  }
}

module attributes {stable_mosaic.version = 11 : i64} {
  func.func @_ffn_residual_ln_kernel(%arg0: i32, %arg1: memref<8x32xf32, #tpu.memory_space<vmem>>, %arg2: memref<64x32xbf16, #tpu.memory_space<vmem>>, %arg3: memref<1x64xf32, #tpu.memory_space<vmem>>, %arg4: memref<32x64xbf16, #tpu.memory_space<vmem>>, %arg5: memref<1x32xf32, #tpu.memory_space<vmem>>, %arg6: memref<1x32xf32, #tpu.memory_space<vmem>>, %arg7: memref<1x32xf32, #tpu.memory_space<vmem>>, %arg8: memref<8x32xf32, #tpu.memory_space<vmem>>) attributes {dimension_semantics = [#tpu.dimension_semantics<parallel>], iteration_bounds = array<i64: 2>, scalar_prefetch = 0 : i64, scratch_operands = 0 : i64, tpu.core_type = #tpu.core_type<tc>, window_params = [{transform_indices = @transform_0, window_bounds = array<i64: 8, 32>}, {pipeline_mode = #tpu.pipeline_mode<synchronous>, transform_indices = @transform_1, window_bounds = array<i64: 64, 32>}, {pipeline_mode = #tpu.pipeline_mode<synchronous>, transform_indices = @transform_2, window_bounds = array<i64: 1, 64>}, {pipeline_mode = #tpu.pipeline_mode<synchronous>, transform_indices = @transform_3, window_bounds = array<i64: 32, 64>}, {pipeline_mode = #tpu.pipeline_mode<synchronous>, transform_indices = @transform_4, window_bounds = array<i64: 1, 32>}, {pipeline_mode = #tpu.pipeline_mode<synchronous>, transform_indices = @transform_5, window_bounds = array<i64: 1, 32>}, {pipeline_mode = #tpu.pipeline_mode<synchronous>, transform_indices = @transform_6, window_bounds = array<i64: 1, 32>}, {transform_indices = @transform_7, window_bounds = array<i64: 8, 32>}]} {
    %c0 = arith.constant 0 : index
    %c0_0 = arith.constant 0 : index
    %0 = vector.load %arg1[%c0, %c0_0] : memref<8x32xf32, #tpu.memory_space<vmem>>, vector<8x32xf32>
    %1 = arith.truncf %0 : vector<8x32xf32> to vector<8x32xbf16>
    %c0_1 = arith.constant 0 : index
    %c0_2 = arith.constant 0 : index
    %2 = vector.load %arg2[%c0_1, %c0_2] : memref<64x32xbf16, #tpu.memory_space<vmem>>, vector<64x32xbf16>
    %cst = arith.constant dense<0.000000e+00> : vector<8x64xf32>
    %3 = tpu.matmul %1, %2, %cst {dimension_numbers = #tpu.dot_dimension_numbers<[1], [1], [0], [0], [0, 0, 1, 0], [], []>} : vector<8x32xbf16>, vector<64x32xbf16>, vector<8x64xf32> -> vector<8x64xf32>
    %c0_3 = arith.constant 0 : index
    %c0_4 = arith.constant 0 : index
    %4 = vector.load %arg3[%c0_3, %c0_4] : memref<1x64xf32, #tpu.memory_space<vmem>>, vector<1x64xf32>
    %5 = vector.broadcast %4 : vector<1x64xf32> to vector<8x64xf32>
    %6 = arith.addf %3, %5 : vector<8x64xf32>
    %cst_5 = arith.constant 0.000000e+00 : f32
    %7 = vector.broadcast %cst_5 : f32 to vector<8x64xf32>
    %8 = arith.maximumf %6, %7 : vector<8x64xf32>
    %9 = arith.truncf %8 : vector<8x64xf32> to vector<8x64xbf16>
    %c0_6 = arith.constant 0 : index
    %c0_7 = arith.constant 0 : index
    %10 = vector.load %arg4[%c0_6, %c0_7] : memref<32x64xbf16, #tpu.memory_space<vmem>>, vector<32x64xbf16>
    %cst_8 = arith.constant dense<0.000000e+00> : vector<8x32xf32>
    %11 = tpu.matmul %9, %10, %cst_8 {dimension_numbers = #tpu.dot_dimension_numbers<[1], [1], [0], [0], [0, 0, 1, 0], [], []>} : vector<8x64xbf16>, vector<32x64xbf16>, vector<8x32xf32> -> vector<8x32xf32>
    %c0_9 = arith.constant 0 : index
    %c0_10 = arith.constant 0 : index
    %12 = vector.load %arg5[%c0_9, %c0_10] : memref<1x32xf32, #tpu.memory_space<vmem>>, vector<1x32xf32>
    %13 = vector.broadcast %12 : vector<1x32xf32> to vector<8x32xf32>
    %14 = arith.addf %11, %13 : vector<8x32xf32>
    %15 = arith.addf %0, %14 : vector<8x32xf32>
    %cst_11 = arith.constant dense<0.000000e+00> : vector<8xf32>
    %16 = vector.multi_reduction <add>, %15, %cst_11 [1] : vector<8x32xf32> to vector<8xf32>
    %17 = vector.shape_cast %16 : vector<8xf32> to vector<8x1xf32>
    %cst_12 = arith.constant 3.200000e+01 : f32
    %18 = vector.broadcast %cst_12 : f32 to vector<8x1xf32>
    %19 = arith.divf %17, %18 : vector<8x1xf32>
    %20 = vector.broadcast %19 : vector<8x1xf32> to vector<8x32xf32>
    %21 = arith.subf %15, %20 : vector<8x32xf32>
    %22 = vector.broadcast %19 : vector<8x1xf32> to vector<8x32xf32>
    %23 = arith.subf %15, %22 : vector<8x32xf32>
    %24 = arith.mulf %21, %23 : vector<8x32xf32>
    %cst_13 = arith.constant dense<0.000000e+00> : vector<8xf32>
    %25 = vector.multi_reduction <add>, %24, %cst_13 [1] : vector<8x32xf32> to vector<8xf32>
    %26 = vector.shape_cast %25 : vector<8xf32> to vector<8x1xf32>
    %cst_14 = arith.constant 3.200000e+01 : f32
    %27 = vector.broadcast %cst_14 : f32 to vector<8x1xf32>
    %28 = arith.divf %26, %27 : vector<8x1xf32>
    %29 = vector.broadcast %19 : vector<8x1xf32> to vector<8x32xf32>
    %30 = arith.subf %15, %29 : vector<8x32xf32>
    %cst_15 = arith.constant 9.99999974E-6 : f32
    %31 = vector.broadcast %cst_15 : f32 to vector<8x1xf32>
    %32 = arith.addf %28, %31 : vector<8x1xf32>
    %33 = math.rsqrt %32 : vector<8x1xf32>
    %34 = vector.broadcast %33 : vector<8x1xf32> to vector<8x32xf32>
    %35 = arith.mulf %30, %34 : vector<8x32xf32>
    %c0_16 = arith.constant 0 : index
    %c0_17 = arith.constant 0 : index
    %36 = vector.load %arg6[%c0_16, %c0_17] : memref<1x32xf32, #tpu.memory_space<vmem>>, vector<1x32xf32>
    %37 = vector.broadcast %36 : vector<1x32xf32> to vector<8x32xf32>
    %38 = arith.mulf %35, %37 : vector<8x32xf32>
    %c0_18 = arith.constant 0 : index
    %c0_19 = arith.constant 0 : index
    %39 = vector.load %arg7[%c0_18, %c0_19] : memref<1x32xf32, #tpu.memory_space<vmem>>, vector<1x32xf32>
    %40 = vector.broadcast %39 : vector<1x32xf32> to vector<8x32xf32>
    %41 = arith.addf %38, %40 : vector<8x32xf32>
    %c0_20 = arith.constant 0 : index
    %c0_21 = arith.constant 0 : index
    %42 = vector.load %arg8[%c0_20, %c0_21] : memref<8x32xf32, #tpu.memory_space<vmem>>, vector<8x32xf32>
    tpu.vector_store %arg8[%c0_20, %c0_21], %41 {strides = array<i32>} : memref<8x32xf32, #tpu.memory_space<vmem>>, vector<8x32xf32>,
    return
  }
  func.func @transform_0(%arg0: i32) -> (i32, i32) {
    %c0_i32 = arith.constant 0 : i32
    %c0_i32_0 = arith.constant 0 : i32
    return %arg0, %c0_i32 : i32, i32
  }
  func.func @transform_1(%arg0: i32) -> (i32, i32) {
    %c0_i32 = arith.constant 0 : i32
    %c0_i32_0 = arith.constant 0 : i32
    %c0_i32_1 = arith.constant 0 : i32
    return %c0_i32, %c0_i32_0 : i32, i32
  }
  func.func @transform_2(%arg0: i32) -> (i32, i32) {
    %c0_i32 = arith.constant 0 : i32
    %c0_i32_0 = arith.constant 0 : i32
    %c0_i32_1 = arith.constant 0 : i32
    return %c0_i32, %c0_i32_0 : i32, i32
  }
  func.func @transform_3(%arg0: i32) -> (i32, i32) {
    %c0_i32 = arith.constant 0 : i32
    %c0_i32_0 = arith.constant 0 : i32
    %c0_i32_1 = arith.constant 0 : i32
    return %c0_i32, %c0_i32_0 : i32, i32
  }
  func.func @transform_4(%arg0: i32) -> (i32, i32) {
    %c0_i32 = arith.constant 0 : i32
    %c0_i32_0 = arith.constant 0 : i32
    %c0_i32_1 = arith.constant 0 : i32
    return %c0_i32, %c0_i32_0 : i32, i32
  }
  func.func @transform_5(%arg0: i32) -> (i32, i32) {
    %c0_i32 = arith.constant 0 : i32
    %c0_i32_0 = arith.constant 0 : i32
    %c0_i32_1 = arith.constant 0 : i32
    return %c0_i32, %c0_i32_0 : i32, i32
  }
  func.func @transform_6(%arg0: i32) -> (i32, i32) {
    %c0_i32 = arith.constant 0 : i32
    %c0_i32_0 = arith.constant 0 : i32
    %c0_i32_1 = arith.constant 0 : i32
    return %c0_i32, %c0_i32_0 : i32, i32
  }
  func.func @transform_7(%arg0: i32) -> (i32, i32) {
    %c0_i32 = arith.constant 0 : i32
    %c0_i32_0 = arith.constant 0 : i32
    return %arg0, %c0_i32 : i32, i32
  }
}

</mosaic_0001>

<bundles_post_ra>
// kernel: transformer_decoder_layer_forward.8
= control target key start
LH: loop header
LB: loop body
LE: loop exit
PB: predicated region body
PF: predicated region fallthrough
CT: control target
= control target key end

     0   :  { %s462_s15 = smov 0   ;;  %s510_s0 = inlined_call_operand.vmem [shape: f32[16,32], index: 0, kind: input, shape index: {}]   ;;  %s511_s1 = inlined_call_operand.vmem [shape: bf16[96,32], index: 1, kind: input, shape index: {}]   ;;  %s512_s2 = inlined_call_operand.vmem [shape: f32[1,96], index: 2, kind: input, shape index: {}]   ;;  %s513_s3 = inlined_call_operand.vmem [shape: f32[1,96], index: 3, kind: input, shape index: {}]   ;;  %s514_s4 = inlined_call_operand.vmem [shape: f32[16,96], index: 4, kind: output, shape index: {}]  }
   0x1 LB: > { %s370_s16 = sadd.s32 4294967295, %s433_s15   ;;  %p374_p0 = scmp.ge.s32.totalorder %s433_s15, 1  ;;  %s433_s15 = sphi %s462_s15, %s14_s15  }
   0x2   : > { %p161_p1 = scmp.lt.s32.totalorder %s433_s15, 3 }
   0x4   : > { %p162_p2 = pnand %p374_p0, %p161_p1 }
   0x5   : > { %v421_v0 = vld [vmem:[%s511_s1] sm:$0xff] (!%p162_p2)   ;;  %v435_v1 = vmov (!%p162_p2), 0.0   ;;  %vm245_vm0 = vcmask (!%p162_p2), 261120   ;;  %v422_v3 = vld [vmem:[%s511_s1 + $0x8] sm:$0xff] (!%p162_p2)   ;;  %vm436_vm1 = vmmov (!%p162_p2), 0   ;;  %v423_v5 = vld [vmem:[%s511_s1 + $0x10] sm:$0xff] (!%p162_p2)  }
   0x6   : > { %165 = sbr.rel (%p162_p2) target bundleno = 271 (0x10f), region = 36  ;;  %395 = vmatprep.subr.bf16.mxu0 (!%p162_p2), %v435_v1  ;;  %v250_v2 = vsel (!%p162_p2), %vm245_vm0, %v421_v0, 0  ;;  %407 = vmatprep.mubr.msk.bf16.mxu0 (!%p162_p2), %vm436_vm1, %v435_v1  ;;  %v253_v4 = vsel (!%p162_p2), %vm245_vm0, %v422_v3, 0  ;;  %v256_v6 = vsel (!%p162_p2), %vm245_vm0, %v423_v5, 0  ;;  %v424_v7 = vld [vmem:[%s511_s1 + $0x18] sm:$0xff] (!%p162_p2)   ;;  %v425_v9 = vld [vmem:[%s511_s1 + $0x20] sm:$0xff] (!%p162_p2)  }
   0x7   : > { %396 = vmatpush3.bf16.xpose.msra.mxu0 (!%p162_p2), %v250_v2  ;;  %v259_v8 = vsel (!%p162_p2), %vm245_vm0, %v424_v7, 0  ;;  %p185_p3 = scmp.lt.s32.totalorder (!%p162_p2), %s370_s16, 1  ;;  %v262_v10 = vsel (!%p162_p2), %vm245_vm0, %v425_v9, 0  ;;  %v426_v11 = vld [vmem:[%s511_s1 + $0x28] sm:$0xff] (!%p162_p2)   ;;  %v377_v15 = vld [vmem:[%s512_s2] ss:$0 sm:$0xff] (!%p162_p2) }
   0x8   : > { %397 = vmatprep.subr.bf16.mxu0 (!%p162_p2), %v435_v1  ;;  %v265_v12 = vsel (!%p162_p2), %vm245_vm0, %v426_v11, 0  ;;  %v385_v17 = vld [vmem:[%s513_s3] ss:$0 sm:$0xff] (!%p162_p2)  ;;  %vm315_vm2 = vcmask (!%p162_p2), 785408  }
   0xd   : > { %s516_s16 = smov (!%p185_p3, %s370_s16), 1 }
   0xe   : > { %s375_s29 = sshll.u32 %s516_s16, 3 }
   0xf   : > { %398 = vmatpush3.bf16.xpose.msra.mxu0 %v253_v4  ;;  %s188_s6 = scalar_lea.vmem %s510_s0, %s375_s29  ;;  %s192_s13 = scalar_lea.vmem %s514_s4, %s375_s29 }
  0x10   : > { %399 = vmatprep.subr.bf16.mxu0 %v435_v1  ;;  %v194_v13 = vld [vmem:[%s188_s6] sm:$0xff] }
  0x11   : > { %v195_v14 = vpack.c.bf16 %v194_v13, %v194_v13 }
  0x17   : > { %400 = vmatpush3.bf16.xpose.msra.mxu0 %v256_v6 }
  0x18   : > { %401 = vmatprep.subr.bf16.mxu0 %v435_v1 }
  0x1f   : > { %402 = vmatpush3.bf16.xpose.msra.mxu0 %v259_v8 }
  0x20   : > { %403 = vmatprep.subr.bf16.mxu0 %v435_v1 }
  0x27   : > { %404 = vmatpush3.bf16.xpose.msra.mxu0 %v262_v10 }
  0x28   : > { %405 = vmatprep.subr.bf16.mxu0 %v435_v1 }
  0x2f   : > { %406 = vmatpush3.bf16.xpose.msra.mxu0 %v265_v12 }
  0x36   : > { %408 = vmatmul.mubr.msk.bf16.vlgmr.msra.gmra.mrb[0].mxu0 %vm245_vm0, %v195_v14 }
 0x109   : > { %v301_v16 = vpop.f32.mrb[0].mxu0 }
 0x10a   : > { %v302_v18 = vadd.f32 %v377_v15, %v301_v16  ;;  %v409_v19 = vpop.f32.mrb[1].mxu0 }
 0x10b   : > { %v304_v20 = vpop.f32.mrb[2].mxu0 }
 0x10c   : > { %v314_v21 = vmul.f32 %v385_v17, %v302_v18  ;;  %v410_v22 = vpop.f32.mrb[3].mxu0 }
 0x10e   : > { %316 = vst.msk [vmem:[%s192_s13] sm:$0xff] %vm315_vm2, %v314_v21 }
 0x10f PF: > { %s14_s15 = sadd.s32 1, %s433_s15  }
 0x110   : > { %p11_p4 = scmp.ge.s32.totalorder %s14_s15, 4  }
 0x112   :  { %13 = sbr.rel (!%p11_p4) target bundleno = 1 (0x1), region = 66 }

// kernel: transformer_decoder_layer_forward.10
= control target key start
LH: loop header
LB: loop body
LE: loop exit
PB: predicated region body
PF: predicated region fallthrough
CT: control target
= control target key end

     0   :  { %s522_s21 = smov 0   ;;  %s568_s0 = inlined_call_operand.vmem [shape: f32[16,32], index: 0, kind: input, shape index: {}]   ;;  %s569_s1 = inlined_call_operand.vmem [shape: f32[16,32], index: 1, kind: input, shape index: {}]   ;;  %s570_s2 = inlined_call_operand.vmem [shape: bf16[32,32], index: 2, kind: input, shape index: {}]   ;;  %s571_s3 = inlined_call_operand.vmem [shape: f32[1,32], index: 3, kind: input, shape index: {}]   ;;  %s572_s4 = inlined_call_operand.vmem [shape: f32[1,32], index: 4, kind: input, shape index: {}]   ;;  %s573_s5 = inlined_call_operand.vmem [shape: f32[1,32], index: 5, kind: input, shape index: {}]   ;;  %s574_s6 = inlined_call_operand.vmem [shape: f32[16,32], index: 6, kind: output, shape index: {}]  }
   0x1 LB: > { %s436_s22 = sadd.s32 4294967295, %s483_s21   ;;  %p440_p0 = scmp.ge.s32.totalorder %s483_s21, 1  ;;  %s483_s21 = sphi %s522_s21, %s16_s21  }
   0x2   : > { %p220_p1 = scmp.lt.s32.totalorder %s483_s21, 3 }
   0x4   : > { %p221_p2 = pnand %p440_p0, %p220_p1 }
   0x5   : > { %v473_v0 = vld [vmem:[%s570_s2] sm:$0xff] (!%p221_p2)   ;;  %v485_v1 = vmov (!%p221_p2), 0.0   ;;  %vm288_vm0 = vcmask (!%p221_p2), 261120   ;;  %p252_p3 = scmp.lt.s32.totalorder (!%p221_p2), %s436_s22, 1  ;;  %vm486_vm1 = vmmov (!%p221_p2), 0   ;;  %v474_v3 = vld [vmem:[%s570_s2 + $0x8] sm:$0xff] (!%p221_p2)  }
   0x6   : > { %224 = sbr.rel (%p221_p2) target bundleno = 552 (0x228), region = 44  ;;  %455 = vmatprep.subr.bf16.mxu0 (!%p221_p2), %v485_v1  ;;  %v293_v2 = vsel (!%p221_p2), %vm288_vm0, %v473_v0, 0  ;;  %459 = vmatprep.mubr.msk.bf16.mxu0 (!%p221_p2), %vm486_vm1, %v485_v1  ;;  %v296_v4 = vsel (!%p221_p2), %vm288_vm0, %v474_v3, 0  ;;  %v444_v7 = vld [vmem:[%s571_s3] ss:$0 sm:$0xff] (!%p221_p2) }
   0x7   : > { %456 = vmatpush3.bf16.xpose.msra.mxu0 (!%p221_p2), %v293_v2  ;;  %v448_v25 = vld [vmem:[%s572_s4] ss:$0 sm:$0xff] (!%p221_p2) }
   0x8   : > { %457 = vmatprep.subr.bf16.mxu0 (!%p221_p2), %v485_v1  ;;  %v449_v27 = vld [vmem:[%s573_s5] ss:$0 sm:$0xff] (!%p221_p2) }
   0xd   : > { %s576_s22 = smov (!%p252_p3, %s436_s22), 1 }
   0xe   : > { %s537_s27 = sshll.u32 %s576_s22, 3 }
   0xf   : > { %s255_s30 = scalar_lea.vmem %s568_s0, %s537_s27  ;;  %458 = vmatpush3.bf16.xpose.msra.mxu0 %v296_v4  ;;  %s259_s9 = scalar_lea.vmem %s569_s1, %s537_s27 }
  0x10   : > { %v265_v5 = vld [vmem:[%s255_s30] sm:$0xff]  ;;  %s263_s18 = scalar_lea.vmem %s574_s6, %s537_s27 }
  0x11   : > { %v266_v6 = vpack.c.bf16 %v265_v5, %v265_v5  ;;  %v338_v9 = vld [vmem:[%s259_s9] sm:$0xff] }
  0x16   : > { %460 = vmatmul.mubr.msk.bf16.vlgmr.msra.gmra.mrb[0].mxu0 %vm288_vm0, %v266_v6 }
  0xe9   : > { %v332_v8 = vpop.f32.mrb[0].mxu0 }
  0xea   : > { %v333_v10 = vadd.f32 %v444_v7, %v332_v8  ;;  %v461_v11 = vpop.f32.mrb[1].mxu0 }
  0xeb   : > { %v335_v12 = vpop.f32.mrb[2].mxu0 }
  0xec   : > { %v462_v13 = vpop.f32.mrb[3].mxu0  ;;  %v339_v14 = vadd.f32 %v338_v9, %v333_v10 }
  0xee   : > { %v340_v15 = vsel %vm288_vm0, %v339_v14, 0.0 }
  0xef   : > { %341 = vadd.xlane.f32.xlu0 %v340_v15 }
 0x17c   : > { %v342_v16 = vpop.xlane.xlu0 %341 }
 0x17d   : > { %v344_v17 = vmul.f32 0.03125, %v342_v16 }
 0x17f   : > { %v345_v18 = vsub.f32 %v339_v14, %v344_v17 }
 0x181   : > { %v346_v19 = vmul.f32 %v345_v18, %v345_v18 }
 0x183   : > { %v347_v20 = vsel %vm288_vm0, %v346_v19, 0.0 }
 0x184   : > { %348 = vadd.xlane.f32.xlu0 %v347_v20 }
 0x211   : > { %v349_v21 = vpop.xlane.xlu0 %348 }
 0x212   : > { %v350_v22 = vmul.f32 0.03125, %v349_v21 }
 0x214   : > { %v351_v23 = vadd.f32 1e-05, %v350_v22 }
 0x216   : > { %475 = vrsqrt.f32 %v351_v23 }
 0x220   : > { %v476_v24 = vpop.eup %475 }
 0x221   : > { %v353_v26 = vmul.f32 %v476_v24, %v345_v18 }
 0x223   : > { %v361_v28 = vmul.f32 %v448_v25, %v353_v26 }
 0x225   : > { %v369_v29 = vadd.f32 %v449_v27, %v361_v28 }
 0x227   : > { %370 = vst.msk [vmem:[%s263_s18] sm:$0xff] %vm288_vm0, %v369_v29 }
 0x228 PF: > { %s16_s21 = sadd.s32 1, %s483_s21  }
 0x229   : > { %p13_p4 = scmp.ge.s32.totalorder %s16_s21, 4  }
 0x22b   :  { %15 = sbr.rel (!%p13_p4) target bundleno = 1 (0x1), region = 77 }

// kernel: transformer_decoder_layer_forward.11
= control target key start
LH: loop header
LB: loop body
LE: loop exit
PB: predicated region body
PF: predicated region fallthrough
CT: control target
= control target key end

     0   :  { %s401_s15 = smov 0   ;;  %s434_s0 = inlined_call_operand.vmem [shape: f32[16,32], index: 0, kind: input, shape index: {}]   ;;  %s435_s1 = inlined_call_operand.vmem [shape: bf16[32,32], index: 1, kind: input, shape index: {}]   ;;  %s436_s2 = inlined_call_operand.vmem [shape: f32[1,32], index: 2, kind: input, shape index: {}]   ;;  %s437_s3 = inlined_call_operand.vmem [shape: f32[1,32], index: 3, kind: input, shape index: {}]   ;;  %s438_s4 = inlined_call_operand.vmem [shape: f32[16,32], index: 4, kind: output, shape index: {}]  }
   0x1 LB: > { %s329_s16 = sadd.s32 4294967295, %s372_s15   ;;  %p333_p0 = scmp.ge.s32.totalorder %s372_s15, 1  ;;  %s372_s15 = sphi %s401_s15, %s14_s15  }
   0x2   : > { %p161_p1 = scmp.lt.s32.totalorder %s372_s15, 3 }
   0x4   : > { %p162_p2 = pnand %p333_p0, %p161_p1 }
   0x5   : > { %v364_v0 = vld [vmem:[%s435_s1] sm:$0xff] (!%p162_p2)   ;;  %v374_v1 = vmov (!%p162_p2), 0.0   ;;  %vm217_vm0 = vcmask (!%p162_p2), 261120   ;;  %p185_p3 = scmp.lt.s32.totalorder (!%p162_p2), %s329_s16, 1  ;;  %vm375_vm1 = vmmov (!%p162_p2), 0   ;;  %v365_v3 = vld [vmem:[%s435_s1 + $0x8] sm:$0xff] (!%p162_p2)  }
   0x6   : > { %165 = sbr.rel (%p162_p2) target bundleno = 239 (0xef), region = 36  ;;  %346 = vmatprep.subr.bf16.mxu0 (!%p162_p2), %v374_v1  ;;  %v222_v2 = vsel (!%p162_p2), %vm217_vm0, %v364_v0, 0  ;;  %350 = vmatprep.mubr.msk.bf16.mxu0 (!%p162_p2), %vm375_vm1, %v374_v1  ;;  %v225_v4 = vsel (!%p162_p2), %vm217_vm0, %v365_v3, 0  ;;  %v336_v7 = vld [vmem:[%s436_s2] ss:$0 sm:$0xff] (!%p162_p2) }
   0x7   : > { %347 = vmatpush3.bf16.xpose.msra.mxu0 (!%p162_p2), %v222_v2  ;;  %v340_v9 = vld [vmem:[%s437_s3] ss:$0 sm:$0xff] (!%p162_p2) }
   0x8   : > { %348 = vmatprep.subr.bf16.mxu0 (!%p162_p2), %v374_v1 }
   0xd   : > { %s440_s16 = smov (!%p185_p3, %s329_s16), 1 }
   0xe   : > { %s334_s21 = sshll.u32 %s440_s16, 3 }
   0xf   : > { %s188_s24 = scalar_lea.vmem %s434_s0, %s334_s21  ;;  %349 = vmatpush3.bf16.xpose.msra.mxu0 %v225_v4  ;;  %s192_s5 = scalar_lea.vmem %s438_s4, %s334_s21 }
  0x10   : > { %v194_v5 = vld [vmem:[%s188_s24] sm:$0xff] }
  0x11   : > { %v195_v6 = vpack.c.bf16 %v194_v5, %v194_v5 }
  0x16   : > { %351 = vmatmul.mubr.msk.bf16.vlgmr.msra.gmra.mrb[0].mxu0 %vm217_vm0, %v195_v6 }
  0xe9   : > { %v261_v8 = vpop.f32.mrb[0].mxu0 }
  0xea   : > { %v262_v10 = vadd.f32 %v336_v7, %v261_v8  ;;  %v352_v11 = vpop.f32.mrb[1].mxu0 }
  0xeb   : > { %v264_v12 = vpop.f32.mrb[2].mxu0 }
  0xec   : > { %v274_v13 = vmul.f32 %v340_v9, %v262_v10  ;;  %v353_v14 = vpop.f32.mrb[3].mxu0 }
  0xee   : > { %275 = vst.msk [vmem:[%s192_s5] sm:$0xff] %vm217_vm0, %v274_v13 }
  0xef PF: > { %s14_s15 = sadd.s32 1, %s372_s15  }
  0xf0   : > { %p11_p4 = scmp.ge.s32.totalorder %s14_s15, 4  }
  0xf2   :  { %13 = sbr.rel (!%p11_p4) target bundleno = 1 (0x1), region = 66 }

// kernel: transformer_decoder_layer_forward.9
= control target key start
LH: loop header
LB: loop body
LE: loop exit
PB: predicated region body
PF: predicated region fallthrough
CT: control target
= control target key end

     0   :  { %s783_s6 = smov 0   ;;  %s873_s0 = inlined_call_operand.vmem [shape: f32[16,96], index: 0, kind: input, shape index: {}]   ;;  %s874_s1 = inlined_call_operand.vmem [shape: f32[16,32], index: 1, kind: output, shape index: {}]  }
   0x1 LB: > { %s628_s7 = sadd.s32 4294967295, %s755_s6   ;;  %p632_p0 = scmp.ge.s32.totalorder %s755_s6, 1  ;;  %s755_s6 = sphi %s783_s6, %s11_s6  }
   0x2   : > { %p86_p1 = scmp.lt.s32.totalorder %s755_s6, 3 }
   0x4   : > { %p87_p2 = pnand %p632_p0, %p86_p1 }
   0x5   : > { %p104_p3 = scmp.lt.s32.totalorder (!%p87_p2), %s628_s7, 1  ;;  %v757_v0 = vmov (!%p87_p2), 0.0   ;;  %vm758_vm0 = vmmov (!%p87_p2), 0   ;;  %s759_s12 = smov (!%p87_p2), 96   ;;  %vm118_vm1 = vcmask (!%p87_p2), 64512   ;;  %vm182_vm2 = vcmask (!%p87_p2), 1043456  }
   0x6   : > { %90 = sbr.rel (%p87_p2) target bundleno = 1596 (0x63c), region = 24  ;;  %661 = vmatprep.subr.bf16.mxu0 (!%p87_p2), %v757_v0  ;;  %663 = vmatprep.mubr.msk.bf16.mxu0 (!%p87_p2), %vm758_vm0, %v757_v0  ;;  %s760_s13 = smov (!%p87_p2), 64   ;;  %vm569_vm3 = vcmask (!%p87_p2), 130048   ;;  %vm571_vm4 = vcmask (!%p87_p2), 195584   ;;  %vm573_vm5 = vcmask (!%p87_p2), 261120  }
   0x7   : > { %667 = vmatprep.subr.bf16.mxu1 (!%p87_p2), %v757_v0  ;;  %669 = vmatprep.mubr.msk.bf16.mxu1 (!%p87_p2), %vm758_vm0, %v757_v0  ;;  %s761_s14 = smov (!%p87_p2), 88   ;;  %s762_s15 = smov (!%p87_p2), 72  }
   0x8   : > { %s763_s16 = smov (!%p87_p2), 120   ;;  %s764_s17 = smov (!%p87_p2), 80  }
   0x9   : > { %s765_s18 = smov (!%p87_p2), 112   ;;  %s766_s19 = smov (!%p87_p2), 104  }
   0xa   : > { %s767_s20 = smov (!%p87_p2), 56   ;;  %s768_s21 = smov (!%p87_p2), 48  }
   0xb   : > { %s769_s22 = smov (!%p87_p2), 40   ;;  %s770_s23 = smov (!%p87_p2), 8  }
   0xc   : > { %s771_s24 = smov (!%p87_p2), 16   ;;  %s772_s25 = smov (!%p87_p2), 24  }
   0xd   : > { %s876_s7 = smov (!%p104_p3, %s628_s7), 1 }
   0xe   : > { %s633_s8 = sshll.u32 %s876_s7, 3 }
   0xf   : > { %s107_s11 = scalar_lea.vmem %s873_s0, %s633_s8  ;;  %s111_s28 = scalar_lea.vmem %s874_s1, %s633_s8 }
  0x10   : > { %v113_v1 = vld [vmem:[%s107_s11] sm:$0xff] }
  0x11   : > { %v805_v2 = vpack.c.bf16 %v113_v1, %v113_v1 }
  0x13   : > { %116 = vrot.lane.b32.xlu0 %v805_v2, %s759_s12  ;;  %177 = vrot.lane.b32.xlu1 %v805_v2, %s760_s13 }
  0x17   : > { %228 = vrot.lane.b32.xlu1 %v805_v2, %s761_s14 }
  0x85   : > { %v117_v3 = vpop.permute.xlu0 %116  ;;  %v178_v10 = vpop.permute.xlu1 %177 }
  0x86   : > { %v123_v4 = vsel %vm118_vm1, %v117_v3, 0  ;;  %v184_v11 = vsel %vm182_vm2, %v178_v10, 0 }
  0x87   : > { %662 = vmatpush3.bf16.xpose.msra.mxu0 %v123_v4  ;;  %668 = vmatpush3.bf16.msra.mxu1 %v184_v11 }
  0x88   : > { %679 = vmatprep.subr.bf16.mxu0 %v757_v0  ;;  %673 = vmatprep.subr.bf16.mxu1 %v757_v0 }
  0x89   : > { %v229_v17 = vpop.permute.xlu1 %228 }
  0x8a   : > { %v234_v23 = vsel %vm118_vm1, %v229_v17, 0 }
  0x8e   : > { %664 = vmatmul.mubr.msk.bf16.vlgmr.msra.gmra.mrb[0].mxu0 %vm118_vm1, %v805_v2 }
  0x8f   : > { %681 = vmatprep.mubr.msk.bf16.mxu0 %vm758_vm0, %v757_v0 }
 0x161   : > { %v159_v5 = vpop.f32.mrb[0].mxu0 }
 0x162   : > { %v665_v6 = vpop.f32.mrb[1].mxu0  ;;  %v165_v7 = vsel %vm118_vm1, %v159_v5, -inf }
 0x163   : > { %166 = vmax.xlane.f32.xlu0 %v165_v7  ;;  %v162_v8 = vpop.f32.mrb[2].mxu0 }
 0x164   : > { %v666_v9 = vpop.f32.mrb[3].mxu0 }
 0x179   : > { %448 = vrot.lane.b32.xlu0 %v805_v2, %s762_s15 }
 0x1f0   : > { %v167_v12 = vpop.xlane.xlu0 %166 }
 0x1f1   : > { %v168_v13 = vsub.f32 %v159_v5, %v167_v12 }
 0x1f3   : > { %v169_v14 = vmul.f32 1.442695, %v168_v13 }
 0x1f4   : > { %v449_v26 = vpop.permute.xlu0 %448 }
 0x1f5   : > { %733 = vpow2.f32 %v169_v14  ;;  %v454_v28 = vsel %vm118_vm1, %v449_v26, 0 }
 0x1ff   : > { %v734_v15 = vpop.eup %733 }
 0x200   : > { %v171_v16 = vsel %vm118_vm1, %v734_v15, 0.0 }
 0x201   : > { %172 = vadd.xlane.f32.xlu1 %v171_v16 }
 0x212   : > { %226 = vrot.lane.b32.xlu1 %v805_v2, %s763_s16 }
 0x216   : > { %338 = vrot.lane.b32.xlu1 %v805_v2, %s764_s17 }
 0x21a   : > { %336 = vrot.lane.b32.xlu1 %v805_v2, %s765_s18 }
 0x21e   : > { %446 = vrot.lane.b32.xlu1 %v805_v2, %s766_s19 }
 0x28e   : > { %v173_v18 = vpop.xlane.xlu1 %172 }
 0x28f   : > { %735 = vrcp.f32 %v173_v18 }
 0x292   : > { %v227_v21 = vpop.permute.xlu1 %226 }
 0x296   : > { %v339_v24 = vpop.permute.xlu1 %338 }
 0x297   : > { %v344_v25 = vsel %vm118_vm1, %v339_v24, 0 }
 0x299   : > { %v736_v19 = vpop.eup %735 }
 0x29a   : > { %v175_v20 = vmul.f32 %v736_v19, %v734_v15  ;;  %v337_v27 = vpop.permute.xlu1 %336 }
 0x29c   : > { %v176_v22 = vpack.c.bf16 %v175_v20, %v175_v20 }
 0x29e   : > { %670 = vmatmul.mubr.msk.bf16.vlgmr.msra.gmra.mrb[0].mxu1 %vm118_vm1, %v176_v22  ;;  %v447_v29 = vpop.permute.xlu1 %446 }
 0x29f   : > { %674 = vmatpush3.bf16.xpose.msra.mxu1 %v234_v23  ;;  %675 = vmatprep.mubr.msk.bf16.mxu1 %vm758_vm0, %v757_v0 }
 0x2a0   : > { %685 = vmatprep.subr.bf16.mxu1 %v757_v0 }
 0x2a6   : > { %676 = vmatmul.mubr.msk.bf16.vlgmr.msra.gmra.mrb[4].mxu1 %vm118_vm1, %v227_v21 }
 0x2a7   : > { %686 = vmatpush3.bf16.xpose.msra.mxu1 %v344_v25  ;;  %687 = vmatprep.mubr.msk.bf16.mxu1 %vm758_vm0, %v757_v0 }
 0x2a8   : > { %697 = vmatprep.subr.bf16.mxu1 %v757_v0 }
 0x2ae   : > { %688 = vmatmul.mubr.msk.bf16.vlgmr.msra.gmra.mrb[8].mxu1 %vm118_vm1, %v337_v27 }
 0x2af   : > { %698 = vmatpush3.bf16.xpose.msra.mxu1 %v454_v28  ;;  %699 = vmatprep.mubr.msk.bf16.mxu1 %vm758_vm0, %v757_v0 }
 0x2b6   : > { %700 = vmatmul.mubr.msk.bf16.vlgmr.msra.gmra.mrb[12].mxu1 %vm118_vm1, %v447_v29 }
 0x371   : > { %v840_v30 = vpop.f32.mrb[0].mxu1 }
 0x372   : > { %v671_v31 = vpop.f32.mrb[1].mxu1 }
 0x373   : > { %v223_v32 = vpop.f32.mrb[2].mxu1 }
 0x374   : > { %v672_v33 = vpop.f32.mrb[3].mxu1 }
 0x379   : > { %v270_v34 = vpop.f32.mrb[4].mxu1 }
 0x37a   : > { %v677_v35 = vpop.f32.mrb[5].mxu1  ;;  %v276_v36 = vsel %vm118_vm1, %v270_v34, -inf }
 0x37b   : > { %277 = vmax.xlane.f32.xlu1 %v276_v36  ;;  %v273_v37 = vpop.f32.mrb[6].mxu1 }
 0x37c   : > { %v678_v38 = vpop.f32.mrb[7].mxu1 }
 0x381   : > { %v380_v39 = vpop.f32.mrb[8].mxu1 }
 0x382   : > { %v386_v40 = vsel %vm118_vm1, %v380_v39, -inf  ;;  %v689_v41 = vpop.f32.mrb[9].mxu1 }
 0x383   : > { %387 = vmax.xlane.f32.xlu0 %v386_v40  ;;  %v383_v42 = vpop.f32.mrb[10].mxu1 }
 0x384   : > { %v690_v43 = vpop.f32.mrb[11].mxu1 }
 0x389   : > { %v490_v44 = vpop.f32.mrb[12].mxu1 }
 0x38a   : > { %v496_v45 = vsel %vm118_vm1, %v490_v44, -inf  ;;  %v701_v46 = vpop.f32.mrb[13].mxu1 }
 0x38b   : > { %497 = vmax.xlane.f32.xlu1 %v496_v45  ;;  %v493_v47 = vpop.f32.mrb[14].mxu1 }
 0x38c   : > { %v702_v48 = vpop.f32.mrb[15].mxu1 }
 0x408   : > { %v278_v49 = vpop.xlane.xlu1 %277 }
 0x409   : > { %v279_v50 = vsub.f32 %v270_v34, %v278_v49 }
 0x40b   : > { %v280_v51 = vmul.f32 1.442695, %v279_v50 }
 0x40d   : > { %737 = vpow2.f32 %v280_v51 }
 0x410   : > { %v388_v59 = vpop.xlane.xlu0 %387 }
 0x411   : > { %v389_v60 = vsub.f32 %v380_v39, %v388_v59 }
 0x413   : > { %v390_v61 = vmul.f32 1.442695, %v389_v60 }
 0x417   : > { %v738_v52 = vpop.eup %737 }
 0x418   : > { %v498_v53 = vpop.xlane.xlu1 %497  ;;  %v282_v54 = vsel %vm118_vm1, %v738_v52, 0.0 }
 0x419   : > { %v499_v55 = vsub.f32 %v490_v44, %v498_v53  ;;  %283 = vadd.xlane.f32.xlu1 %v282_v54 }
 0x41b   : > { %v500_v56 = vmul.f32 1.442695, %v499_v55 }
 0x41d   : > { %739 = vpow2.f32 %v500_v56 }
 0x41e   : > { %741 = vpow2.f32 %v390_v61 }
 0x427   : > { %v740_v57 = vpop.eup %739 }
 0x428   : > { %v502_v58 = vsel %vm118_vm1, %v740_v57, 0.0  ;;  %v742_v62 = vpop.eup %741 }
 0x429   : > { %503 = vadd.xlane.f32.xlu0 %v502_v58  ;;  %v392_v63 = vsel %vm118_vm1, %v742_v62, 0.0 }
 0x42a   : > { %288 = vrot.lane.b32.xlu1 %v805_v2, %s767_s20 }
 0x43f   : > { %398 = vrot.lane.b32.xlu0 %v805_v2, %s768_s21 }
 0x44e   : > { %393 = vadd.xlane.f32.xlu1 %v392_v63 }
 0x45f   : > { %508 = vrot.lane.b32.xlu1 %v805_v2, %s769_s22 }
 0x4a6   : > { %v284_v1 = vpop.xlane.xlu1 %283 }
 0x4a7   : > { %743 = vrcp.f32 %v284_v1 }
 0x4aa   : > { %v289_v3 = vpop.permute.xlu1 %288 }
 0x4ab   : > { %v294_v4 = vsel %vm182_vm2, %v289_v3, 0 }
 0x4ac   : > { %680 = vmatpush3.bf16.msra.mxu0 %v294_v4 }
 0x4ad   : > { %691 = vmatprep.subr.bf16.mxu0 %v757_v0 }
 0x4b1   : > { %v744_v5 = vpop.eup %743 }
 0x4b2   : > { %v286_v6 = vmul.f32 %v744_v5, %v738_v52 }
 0x4b4   : > { %v287_v7 = vpack.c.bf16 %v286_v6, %v286_v6 }
 0x4b6   : > { %682 = vmatmul.mubr.msk.bf16.vlgmr.msra.gmra.mrb[4].mxu0 %vm118_vm1, %v287_v7  ;;  %v504_v8 = vpop.xlane.xlu0 %503 }
 0x4b7   : > { %693 = vmatprep.mubr.msk.bf16.mxu0 %vm758_vm0, %v757_v0 }
 0x4ba   : > { %v399_v9 = vpop.permute.xlu0 %398 }
 0x4bb   : > { %v404_v2 = vsel %vm182_vm2, %v399_v9, 0 }
 0x4bc   : > { %692 = vmatpush3.bf16.msra.mxu0 %v404_v2 }
 0x4bd   : > { %703 = vmatprep.subr.bf16.mxu0 %v757_v0 }
 0x4db   : > { %v394_v10 = vpop.xlane.xlu1 %393 }
 0x4dc   : > { %745 = vrcp.f32 %v394_v10 }
 0x4dd   : > { %747 = vrcp.f32 %v504_v8 }
 0x4df   : > { %v509_v12 = vpop.permute.xlu1 %508 }
 0x4e0   : > { %v514_v14 = vsel %vm182_vm2, %v509_v12, 0 }
 0x4e6   : > { %v746_v11 = vpop.eup %745 }
 0x4e7   : > { %v396_v13 = vmul.f32 %v746_v11, %v742_v62  ;;  %v748_v16 = vpop.eup %747 }
 0x4e8   : > { %v506_v17 = vmul.f32 %v748_v16, %v740_v57 }
 0x4e9   : > { %v397_v15 = vpack.c.bf16 %v396_v13, %v396_v13 }
 0x4ea   : > { %v507_v18 = vpack.c.bf16 %v506_v17, %v506_v17 }
 0x4eb   : > { %694 = vmatmul.mubr.msk.bf16.vlgmr.msra.gmra.mrb[8].mxu0 %vm118_vm1, %v397_v15 }
 0x4ec   : > { %704 = vmatpush3.bf16.msra.mxu0 %v514_v14  ;;  %705 = vmatprep.mubr.msk.bf16.mxu0 %vm758_vm0, %v757_v0 }
 0x4f3   : > { %706 = vmatmul.mubr.msk.bf16.vlgmr.msra.gmra.mrb[12].mxu0 %vm118_vm1, %v507_v18 }
 0x589   : > { %v330_v19 = vpop.f32.mrb[4].mxu0 }
 0x58a   : > { %557 = vrot.lane.b32.xlu1 %v330_v19, %s770_s23  ;;  %v683_v20 = vpop.f32.mrb[5].mxu0 }
 0x58b   : > { %v333_v21 = vpop.f32.mrb[6].mxu0 }
 0x58c   : > { %v684_v22 = vpop.f32.mrb[7].mxu0 }
 0x5be   : > { %v440_v23 = vpop.f32.mrb[8].mxu0 }
 0x5bf   : > { %561 = vrot.lane.b32.xlu0 %v440_v23, %s771_s24  ;;  %v695_v24 = vpop.f32.mrb[9].mxu0 }
 0x5c0   : > { %v443_v25 = vpop.f32.mrb[10].mxu0 }
 0x5c1   : > { %v696_v26 = vpop.f32.mrb[11].mxu0 }
 0x5c6   : > { %v550_v27 = vpop.f32.mrb[12].mxu0 }
 0x5c7   : > { %565 = vrot.lane.b32.xlu1 %v550_v27, %s772_s25  ;;  %v707_v0 = vpop.f32.mrb[13].mxu0 }
 0x5c8   : > { %v553_v28 = vpop.f32.mrb[14].mxu0 }
 0x5c9   : > { %v708_v29 = vpop.f32.mrb[15].mxu0 }
 0x5fc   : > { %v558_v31 = vpop.permute.xlu1 %557 }
 0x5fd   : > { %v568_v33 = vsel %vm118_vm1, %v840_v30, %v558_v31 }
 0x631   : > { %v562_v32 = vpop.permute.xlu0 %561 }
 0x632   : > { %v570_v34 = vsel %vm569_vm3, %v568_v33, %v562_v32 }
 0x639   : > { %v566_v35 = vpop.permute.xlu1 %565 }
 0x63a   : > { %v572_v36 = vsel %vm571_vm4, %v570_v34, %v566_v35 }
 0x63b   : > { %574 = vst.msk [vmem:[%s111_s28] sm:$0xff] %vm573_vm5, %v572_v36 }
 0x63c PF: > { %s11_s6 = sadd.s32 1, %s755_s6  }
 0x63d   : > { %p8_p4 = scmp.ge.s32.totalorder %s11_s6, 4  }
 0x63f   :  { %10 = sbr.rel (!%p8_p4) target bundleno = 1 (0x1), region = 54 }

// kernel: transformer_decoder_layer_forward.12
= control target key start
LH: loop header
LB: loop body
LE: loop exit
PB: predicated region body
PF: predicated region fallthrough
CT: control target
= control target key end

     0   :  { %s432_s15 = smov 0   ;;  %s472_s0 = inlined_call_operand.vmem [shape: f32[16,32], index: 0, kind: input, shape index: {}]   ;;  %s473_s1 = inlined_call_operand.vmem [shape: bf16[64,32], index: 1, kind: input, shape index: {}]   ;;  %s474_s2 = inlined_call_operand.vmem [shape: f32[1,64], index: 2, kind: input, shape index: {}]   ;;  %s475_s3 = inlined_call_operand.vmem [shape: f32[1,64], index: 3, kind: input, shape index: {}]   ;;  %s476_s4 = inlined_call_operand.vmem [shape: f32[16,64], index: 4, kind: output, shape index: {}]  }
   0x1 LB: > { %s350_s16 = sadd.s32 4294967295, %s403_s15   ;;  %p354_p0 = scmp.ge.s32.totalorder %s403_s15, 1  ;;  %s403_s15 = sphi %s432_s15, %s14_s15  }
   0x2   : > { %p161_p1 = scmp.lt.s32.totalorder %s403_s15, 3 }
   0x4   : > { %p162_p2 = pnand %p354_p0, %p161_p1 }
   0x5   : > { %v393_v0 = vld [vmem:[%s473_s1] sm:$0xff] (!%p162_p2)   ;;  %v405_v1 = vmov (!%p162_p2), 0.0   ;;  %vm231_vm0 = vcmask (!%p162_p2), 261120   ;;  %v394_v3 = vld [vmem:[%s473_s1 + $0x8] sm:$0xff] (!%p162_p2)   ;;  %vm406_vm1 = vmmov (!%p162_p2), 0   ;;  %v395_v5 = vld [vmem:[%s473_s1 + $0x10] sm:$0xff] (!%p162_p2)  }
   0x6   : > { %165 = sbr.rel (%p162_p2) target bundleno = 255 (0xff), region = 36  ;;  %371 = vmatprep.subr.bf16.mxu0 (!%p162_p2), %v405_v1  ;;  %v236_v2 = vsel (!%p162_p2), %vm231_vm0, %v393_v0, 0  ;;  %379 = vmatprep.mubr.msk.bf16.mxu0 (!%p162_p2), %vm406_vm1, %v405_v1  ;;  %v239_v4 = vsel (!%p162_p2), %vm231_vm0, %v394_v3, 0  ;;  %p185_p3 = scmp.lt.s32.totalorder (!%p162_p2), %s350_s16, 1  ;;  %v242_v6 = vsel (!%p162_p2), %vm231_vm0, %v395_v5, 0  ;;  %v396_v7 = vld [vmem:[%s473_s1 + $0x18] sm:$0xff] (!%p162_p2)  }
   0x7   : > { %372 = vmatpush3.bf16.xpose.msra.mxu0 (!%p162_p2), %v236_v2  ;;  %v245_v8 = vsel (!%p162_p2), %vm231_vm0, %v396_v7, 0  ;;  %v357_v11 = vld [vmem:[%s474_s2] ss:$0 sm:$0xff] (!%p162_p2)  ;;  %vm295_vm2 = vcmask (!%p162_p2), 523264  }
   0x8   : > { %373 = vmatprep.subr.bf16.mxu0 (!%p162_p2), %v405_v1  ;;  %v363_v13 = vld [vmem:[%s475_s3] ss:$0 sm:$0xff] (!%p162_p2) }
   0xd   : > { %s478_s16 = smov (!%p185_p3, %s350_s16), 1 }
   0xe   : > { %s355_s25 = sshll.u32 %s478_s16, 3 }
   0xf   : > { %374 = vmatpush3.bf16.xpose.msra.mxu0 %v239_v4  ;;  %s188_s28 = scalar_lea.vmem %s472_s0, %s355_s25  ;;  %s192_s9 = scalar_lea.vmem %s476_s4, %s355_s25 }
  0x10   : > { %375 = vmatprep.subr.bf16.mxu0 %v405_v1  ;;  %v194_v9 = vld [vmem:[%s188_s28] sm:$0xff] }
  0x11   : > { %v195_v10 = vpack.c.bf16 %v194_v9, %v194_v9 }
  0x17   : > { %376 = vmatpush3.bf16.xpose.msra.mxu0 %v242_v6 }
  0x18   : > { %377 = vmatprep.subr.bf16.mxu0 %v405_v1 }
  0x1f   : > { %378 = vmatpush3.bf16.xpose.msra.mxu0 %v245_v8 }
  0x26   : > { %380 = vmatmul.mubr.msk.bf16.vlgmr.msra.gmra.mrb[0].mxu0 %vm231_vm0, %v195_v10 }
  0xf9   : > { %v281_v12 = vpop.f32.mrb[0].mxu0 }
  0xfa   : > { %v282_v14 = vadd.f32 %v357_v11, %v281_v12  ;;  %v381_v15 = vpop.f32.mrb[1].mxu0 }
  0xfb   : > { %v284_v16 = vpop.f32.mrb[2].mxu0 }
  0xfc   : > { %v294_v17 = vmul.f32 %v363_v13, %v282_v14  ;;  %v382_v18 = vpop.f32.mrb[3].mxu0 }
  0xfe   : > { %296 = vst.msk [vmem:[%s192_s9] sm:$0xff] %vm295_vm2, %v294_v17 }
  0xff PF: > { %s14_s15 = sadd.s32 1, %s403_s15  }
 0x100   : > { %p11_p4 = scmp.ge.s32.totalorder %s14_s15, 4  }
 0x102   :  { %13 = sbr.rel (!%p11_p4) target bundleno = 1 (0x1), region = 66 }

// kernel: transformer_decoder_layer_forward.15
= control target key start
LH: loop header
LB: loop body
LE: loop exit
PB: predicated region body
PF: predicated region fallthrough
CT: control target
= control target key end

     0   :  { %s643_s24 = smov 0   ;;  %s708_s0 = inlined_call_operand.vmem [shape: f32[16,32], index: 0, kind: input, shape index: {}]   ;;  %s709_s1 = inlined_call_operand.vmem [shape: bf16[64,32], index: 1, kind: input, shape index: {}]   ;;  %s710_s2 = inlined_call_operand.vmem [shape: f32[1,64], index: 2, kind: input, shape index: {}]   ;;  %s711_s3 = inlined_call_operand.vmem [shape: bf16[32,64], index: 3, kind: input, shape index: {}]   ;;  %s712_s4 = inlined_call_operand.vmem [shape: f32[1,32], index: 4, kind: input, shape index: {}]   ;;  %s713_s5 = inlined_call_operand.vmem [shape: f32[1,32], index: 5, kind: input, shape index: {}]   ;;  %s714_s6 = inlined_call_operand.vmem [shape: f32[1,32], index: 6, kind: input, shape index: {}]   ;;  %s715_s7 = inlined_call_operand.vmem [shape: f32[16,32], index: 7, kind: output, shape index: {}]  }
   0x1 LB: > { %s526_s25 = sadd.s32 4294967295, %s599_s24   ;;  %p530_p0 = scmp.ge.s32.totalorder %s599_s24, 1  ;;  %s599_s24 = sphi %s643_s24, %s17_s24  }
   0x2   : > { %p236_p1 = scmp.lt.s32.totalorder %s599_s24, 3 }
   0x4   : > { %p237_p2 = pnand %p530_p0, %p236_p1 }
   0x5   : > { %v585_v0 = vld [vmem:[%s709_s1] sm:$0xff] (!%p237_p2)   ;;  %v601_v1 = vmov (!%p237_p2), 0.0   ;;  %vm312_vm0 = vcmask (!%p237_p2), 261120   ;;  %v586_v3 = vld [vmem:[%s709_s1 + $0x8] sm:$0xff] (!%p237_p2)   ;;  %vm602_vm1 = vmmov (!%p237_p2), 0   ;;  %vm391_vm2 = vcmask (!%p237_p2), 523264  }
   0x6   : > { %240 = sbr.rel (%p237_p2) target bundleno = 786 (0x312), region = 48  ;;  %555 = vmatprep.subr.bf16.mxu0 (!%p237_p2), %v601_v1  ;;  %567 = vmatprep.subr.bf16.mxu1 (!%p237_p2), %v601_v1  ;;  %v317_v2 = vsel (!%p237_p2), %vm312_vm0, %v585_v0, 0  ;;  %v589_v4 = vld [vmem:[%s711_s3] sm:$0xff] (!%p237_p2)   ;;  %v320_v6 = vsel (!%p237_p2), %vm312_vm0, %v586_v3, 0  ;;  %v587_v7 = vld [vmem:[%s709_s1 + $0x10] sm:$0xff] (!%p237_p2)   ;;  %p266_p3 = scmp.lt.s32.totalorder (!%p237_p2), %s526_s25, 1 }
   0x7   : > { %556 = vmatpush3.bf16.xpose.msra.mxu0 (!%p237_p2), %v317_v2  ;;  %563 = vmatprep.mubr.msk.bf16.mxu0 (!%p237_p2), %vm602_vm1, %v601_v1  ;;  %v396_v5 = vsel (!%p237_p2), %vm391_vm2, %v589_v4, 0  ;;  %v323_v8 = vsel (!%p237_p2), %vm312_vm0, %v587_v7, 0  ;;  %v588_v9 = vld [vmem:[%s709_s1 + $0x18] sm:$0xff] (!%p237_p2)   ;;  %v590_v13 = vld [vmem:[%s711_s3 + $0x8] sm:$0xff] (!%p237_p2)   ;;  %v533_v15 = vld [vmem:[%s710_s2] ss:$0 sm:$0xff] (!%p237_p2) }
   0x8   : > { %557 = vmatprep.subr.bf16.mxu0 (!%p237_p2), %v601_v1  ;;  %571 = vmatprep.mubr.msk.bf16.mxu1 (!%p237_p2), %vm602_vm1, %v601_v1  ;;  %v326_v10 = vsel (!%p237_p2), %vm312_vm0, %v588_v9, 0  ;;  %v399_v14 = vsel (!%p237_p2), %vm391_vm2, %v590_v13, 0  ;;  %v539_v23 = vld [vmem:[%s712_s4] ss:$0 sm:$0xff] (!%p237_p2) }
   0x9   : > { %568 = vmatpush3.bf16.xpose.msra.mxu1 (!%p237_p2), %v396_v5  ;;  %v543_v40 = vld [vmem:[%s713_s5] ss:$0 sm:$0xff] (!%p237_p2) }
   0xa   : > { %569 = vmatprep.subr.bf16.mxu1 (!%p237_p2), %v601_v1  ;;  %v544_v42 = vld [vmem:[%s714_s6] ss:$0 sm:$0xff] (!%p237_p2) }
   0xd   : > { %s717_s25 = smov (!%p266_p3, %s526_s25), 1 }
   0xe   : > { %s531_s13 = sshll.u32 %s717_s25, 3 }
   0xf   : > { %558 = vmatpush3.bf16.xpose.msra.mxu0 %v320_v6  ;;  %s269_s16 = scalar_lea.vmem %s708_s0, %s531_s13  ;;  %s273_s8 = scalar_lea.vmem %s715_s7, %s531_s13 }
  0x10   : > { %559 = vmatprep.subr.bf16.mxu0 %v601_v1  ;;  %v275_v11 = vld [vmem:[%s269_s16] sm:$0xff] }
  0x11   : > { %v276_v12 = vpack.c.bf16 %v275_v11, %v275_v11  ;;  %570 = vmatpush3.bf16.xpose.msra.mxu1 %v399_v14 }
  0x17   : > { %560 = vmatpush3.bf16.xpose.msra.mxu0 %v323_v8 }
  0x18   : > { %561 = vmatprep.subr.bf16.mxu0 %v601_v1 }
  0x1f   : > { %562 = vmatpush3.bf16.xpose.msra.mxu0 %v326_v10 }
  0x26   : > { %564 = vmatmul.mubr.msk.bf16.vlgmr.msra.gmra.mrb[0].mxu0 %vm312_vm0, %v276_v12 }
  0xf9   : > { %v362_v16 = vpop.f32.mrb[0].mxu0 }
  0xfa   : > { %v363_v17 = vadd.f32 %v533_v15, %v362_v16  ;;  %v565_v18 = vpop.f32.mrb[1].mxu0 }
  0xfb   : > { %v365_v19 = vpop.f32.mrb[2].mxu0 }
  0xfc   : > { %v368_v20 = vmax.f32 %v363_v17, 0.0  ;;  %v566_v21 = vpop.f32.mrb[3].mxu0 }
  0xfe   : > { %v369_v22 = vpack.c.bf16 %v368_v20, %v368_v20 }
 0x100   : > { %572 = vmatmul.mubr.msk.bf16.vlgmr.msra.gmra.mrb[0].mxu1 %vm391_vm2, %v369_v22 }
 0x1d3   : > { %v435_v24 = vpop.f32.mrb[0].mxu1 }
 0x1d4   : > { %v436_v25 = vadd.f32 %v539_v23, %v435_v24  ;;  %v573_v26 = vpop.f32.mrb[1].mxu1 }
 0x1d5   : > { %v438_v27 = vpop.f32.mrb[2].mxu1 }
 0x1d6   : > { %v574_v28 = vpop.f32.mrb[3].mxu1  ;;  %v441_v29 = vadd.f32 %v436_v25, %v275_v11 }
 0x1d8   : > { %v442_v30 = vsel %vm312_vm0, %v441_v29, 0.0 }
 0x1d9   : > { %443 = vadd.xlane.f32.xlu0 %v442_v30 }
 0x266   : > { %v444_v31 = vpop.xlane.xlu0 %443 }
 0x267   : > { %v446_v32 = vmul.f32 0.03125, %v444_v31 }
 0x269   : > { %v447_v33 = vsub.f32 %v441_v29, %v446_v32 }
 0x26b   : > { %v448_v34 = vmul.f32 %v447_v33, %v447_v33 }
 0x26d   : > { %v449_v35 = vsel %vm312_vm0, %v448_v34, 0.0 }
 0x26e   : > { %450 = vadd.xlane.f32.xlu0 %v449_v35 }
 0x2fb   : > { %v451_v36 = vpop.xlane.xlu0 %450 }
 0x2fc   : > { %v452_v37 = vmul.f32 0.03125, %v451_v36 }
 0x2fe   : > { %v453_v38 = vadd.f32 1e-05, %v452_v37 }
 0x300   : > { %591 = vrsqrt.f32 %v453_v38 }
 0x30a   : > { %v592_v39 = vpop.eup %591 }
 0x30b   : > { %v455_v41 = vmul.f32 %v592_v39, %v447_v33 }
 0x30d   : > { %v463_v43 = vmul.f32 %v543_v40, %v455_v41 }
 0x30f   : > { %v471_v44 = vadd.f32 %v544_v42, %v463_v43 }
 0x311   : > { %472 = vst.msk [vmem:[%s273_s8] sm:$0xff] %vm312_vm0, %v471_v44 }
 0x312 PF: > { %s17_s24 = sadd.s32 1, %s599_s24  }
 0x313   : > { %p14_p4 = scmp.ge.s32.totalorder %s17_s24, 4  }
 0x315   :  { %16 = sbr.rel (!%p14_p4) target bundleno = 1 (0x1), region = 78 }

// kernel: transformer_decoder_layer_forward.13
= control target key start
LH: loop header
LB: loop body
LE: loop exit
PB: predicated region body
PF: predicated region fallthrough
CT: control target
= control target key end

     0   :  { %10 = vsyncpa [#allocation3], 0  ;;  %s1273_s0 = inlined_call_operand.vmem [shape: f32[16,32], index: 0, kind: input, shape index: {}]   ;;  %s1274_s1 = inlined_call_operand.vmem [shape: f32[16,64], index: 1, kind: input, shape index: {}]   ;;  %s1275_s2 = inlined_call_operand.vmem [shape: f32[2,1,8], index: 2, kind: input, shape index: {}]   ;;  %s1276_s3 = inlined_call_operand.vmem [shape: f32[16,32], index: 3, kind: output, shape index: {0}]   ;;  %s1277_s4 = inlined_call_operand.hbm [shape: f32[2,8,8], index: 4, kind: output, shape index: {1}]  }
   0x1   :  { %12 = vsyncpa [#allocation3 + $0x1], 0  ;;  %s1091_s15 = smov 0   ;;  %s1093_s16 = smov 0  }
   0x2   :  { %s1095_s17 = smov 0   ;;  %s1097_s18 = smov 0  }
   0x3 LB: > { %s1112_s19 = sadd.s32 4294967295, %s1051_s18   ;;  %s837_s20 = sadd.s32 4294967294, %s1051_s18   ;;  %s1051_s18 = sphi %s1097_s18, %s1283_s18   ;;  %s1047_s17 = sphi %s1095_s17, %s1282_s17   ;;  %s1043_s16 = sphi %s1093_s16, %s1281_s16   ;;  %s1039_s15 = sphi %s1091_s15, %s1280_s15  }
   0x4   : > { %s1116_s21 = sadd.s32 1, %s1051_s18   ;;  %s129_s22 = sadd.s32 1, %s1047_s17 }
   0x5   : > { %s126_s23 = ssub.s32 %s1051_s18, %s1116_s21  ;;  %p139_p0 = scmp.ne.s32.totalorder %s1047_s17, %s1043_s16 }
   0x6   : > { %p127_p1 = scmp.eq.s32.totalorder %s126_s23, 0  ;;  %p140_p2 = scmp.eq.s32.totalorder %s1112_s19, 1 }
   0x7   : > { %p145_p3 = scmp.ne.s32.totalorder %s1043_s16, %s1039_s15  ;;  %p146_p4 = scmp.eq.s32.totalorder %s837_s20, 1 }
   0x8   : > { %s1127_s24 = scalar_select %p127_p1, %s1047_s17, %s129_s22  }
   0x9   : > { %p1129_p5 = por %p140_p2, %p139_p0  ;;  %p1133_p6 = por %p146_p4, %p145_p3 }
   0xa   : > { %p840_p7 = scmp.ge.s32.totalorder %s1051_s18, 1  ;;  %p184_p8 = scmp.lt.s32.totalorder %s1051_s18, 3 }
   0xc   : > { %p185_p9 = pnand %p840_p7, %p184_p8 }
   0xd   : > { %p220_p10 = scmp.lt.s32.totalorder (!%p185_p9), %s1112_s19, 1  ;;  %v1053_v0 = vmov (!%p185_p9), 0.0   ;;  %vm1054_vm0 = vmmov (!%p185_p9), 0   ;;  %vm247_vm1 = vcmask (!%p185_p9), 64512   ;;  %s1055_s12 = smov (!%p185_p9), 96   ;;  %vm312_vm2 = vcmask (!%p185_p9), 1043456  }
   0xe   : > { %188 = sbr.rel (%p185_p9) target bundleno = 1453 (0x5ad), region = 32  ;;  %874 = vmatprep.subr.bf16.mxu0 (!%p185_p9), %v1053_v0  ;;  %876 = vmatprep.mubr.msk.bf16.mxu0 (!%p185_p9), %vm1054_vm0, %v1053_v0  ;;  %s1056_s13 = smov (!%p185_p9), 120  }
   0xf   : > { %880 = vmatprep.subr.bf16.mxu1 (!%p185_p9), %v1053_v0  ;;  %882 = vmatprep.mubr.msk.bf16.mxu1 (!%p185_p9), %vm1054_vm0, %v1053_v0  ;;  %s1057_s14 = smov (!%p185_p9), 112   ;;  %s1058_s20 = smov (!%p185_p9), 104  }
  0x10   : > { %s1059_s22 = smov (!%p185_p9), 88   ;;  %s1060_s23 = smov (!%p185_p9), 72  }
  0x11   : > { %s217_s29 = sand.u32 (!%p185_p9), 1, %s1043_s16   ;;  %s1062_s6 = smov (!%p185_p9), 8  }
  0x12   : > { %s841_s30 = sshll.u32 (!%p185_p9), %s217_s29, 3  ;;  %s855_s7 = sshll.u32 (!%p185_p9), %s1112_s19, 7 }
  0x15   : > { %s221_s27 = scalar_select %p220_p10, %s1112_s19, 1 }
  0x17   : > { %s1147_s28 = sshll.u32 %s221_s27, 3  ;;  %s230_s11 = scalar_lea.vmem %s1275_s2, %s221_s27 }
  0x18   : > { %s227_s5 = scalar_lea.vmem %s1274_s1, %s1147_s28  ;;  %s223_s8 = scalar_lea.vmem %s1273_s0, %s1147_s28  ;;  %v1168_v6 = vld [vmem:[%s230_s11] ss:$0 sm:$0xff] }
  0x19   : > { %v238_v1 = vld [vmem:[%s227_s5] sm:$0xff]  ;;  %s1061_s27 = smov 80   ;;  %s219_s5 = scalar_lea.vmem [#allocation2], %s841_s30 }
  0x1a   : > { %v1153_v2 = vpack.c.bf16 %v238_v1, %v238_v1  ;;  %v236_v4 = vld [vmem:[%s223_s8] sm:$0xff]  ;;  %s733_s8 = sshll.u32 %s219_s5, 4  ;;  %s1231_s11 = scalar_lea.hbm %s1277_s4, %s855_s7  ;;  %s734_s8 = int_to_ptr.vmem [resolvable:$true] %s733_s8 }
  0x1b   : > { %v237_v5 = vpack.c.bf16 %v236_v4, %v236_v4 }
  0x1c   : > { %v252_v3 = vsel %vm247_vm1, %v1153_v2, 0  ;;  %307 = vrot.lane.b32.xlu1 %v1153_v2, %s1055_s12  ;;  %s717_s12 = scalar_lea.sflag [#allocation3], %s217_s29 }
  0x1d   : > { %875 = vmatpush3.bf16.xpose.msra.mxu0 %v252_v3 }
  0x1e   : > { %892 = vmatprep.subr.bf16.mxu0 %v1053_v0 }
  0x20   : > { %360 = vrot.lane.b32.xlu1 %v1153_v2, %s1056_s13 }
  0x24   : > { %877 = vmatmul.mubr.msk.bf16.vlgmr.msra.gmra.mrb[0].mxu0 %vm247_vm1, %v237_v5  ;;  %471 = vrot.lane.b32.xlu1 %v1153_v2, %s1057_s14 }
  0x25   : > { %894 = vmatprep.mubr.msk.bf16.mxu0 %vm1054_vm0, %v1053_v0 }
  0x28   : > { %469 = vrot.lane.b32.xlu1 %v237_v5, %s1057_s14  ;;  %s1063_s14 = smov [#allocation2]  }
  0x2c   : > { %582 = vrot.lane.b32.xlu1 %v1153_v2, %s1058_s20 }
  0x30   : > { %580 = vrot.lane.b32.xlu1 %v237_v5, %s1058_s20  ;;  %s993_s20 = sshll.u32 %s1063_s14, 4  ;;  %s994_s20 = int_to_ptr.vmem [resolvable:$false] %s993_s20 }
  0x31   : > { %p996_p0 = scmp.lt.s32.totalorder %s734_s8, %s994_s20 }
  0x8e   : > { %v308_v18 = vpop.permute.xlu1 %307 }
  0x8f   : > { %v314_v19 = vsel %vm312_vm2, %v308_v18, 0 }
  0x90   : > { %881 = vmatpush3.bf16.msra.mxu1 %v314_v19 }
  0x91   : > { %886 = vmatprep.subr.bf16.mxu1 %v1053_v0 }
  0x92   : > { %v361_v22 = vpop.permute.xlu1 %360 }
  0x93   : > { %v366_v24 = vsel %vm247_vm1, %v361_v22, 0 }
  0x96   : > { %v472_v26 = vpop.permute.xlu1 %471 }
  0x97   : > { %v477_v29 = vsel %vm247_vm1, %v472_v26, 0 }
  0x9a   : > { %v470_v28 = vpop.permute.xlu1 %469 }
  0x9e   : > { %v583_v30 = vpop.permute.xlu1 %582 }
  0x9f   : > { %v588_v31 = vsel %vm247_vm1, %v583_v30, 0 }
  0xa2   : > { %v581_v32 = vpop.permute.xlu1 %580 }
  0xf7   : > { %v288_v7 = vpop.f32.mrb[0].mxu0 }
  0xf8   : > { %v289_v8 = vadd.f32 %v1168_v6, %v288_v7  ;;  %v878_v9 = vpop.f32.mrb[1].mxu0 }
  0xf9   : > { %v291_v10 = vpop.f32.mrb[2].mxu0 }
  0xfa   : > { %v879_v11 = vpop.f32.mrb[3].mxu0  ;;  %v294_v12 = vsel %vm247_vm1, %v289_v8, -inf }
  0xfb   : > { %295 = vmax.xlane.f32.xlu0 %v294_v12 }
 0x188   : > { %v296_v13 = vpop.xlane.xlu0 %295 }
 0x189   : > { %v297_v14 = vsub.f32 %v289_v8, %v296_v13 }
 0x18b   : > { %v298_v15 = vmul.f32 1.442695, %v297_v14 }
 0x18d   : > { %973 = vpow2.f32 %v298_v15 }
 0x197   : > { %v974_v16 = vpop.eup %973 }
 0x198   : > { %v300_v17 = vsel %vm247_vm1, %v974_v16, 0.0 }
 0x199   : > { %301 = vadd.xlane.f32.xlu0 %v300_v17 }
 0x1af   : > { %358 = vrot.lane.b32.xlu0 %v237_v5, %s1056_s13  ;;  %s989_s13 = scalar_lea.vmem %s734_s8, 128 }
 0x1b0   : > { %p990_p11 = scmp.ne.s32.totalorder %s734_s8, %s989_s13 }
 0x1b2   : > { %p991_p12 = pnand %p990_p11, %p1129_p5 }
 0x1b4   : > { %p992_p13 = pneg %p991_p12 }
 0x226   : > { %v302_v20 = vpop.xlane.xlu0 %301 }
 0x227   : > { %975 = vrcp.f32 %v302_v20 }
 0x22a   : > { %v359_v27 = vpop.permute.xlu0 %358 }
 0x231   : > { %v976_v21 = vpop.eup %975 }
 0x232   : > { %v1179_v23 = vmul.f32 %v976_v21, %v974_v16 }
 0x234   : > { %v305_v25 = vpack.c.bf16 %v1179_v23, %v1179_v23 }
 0x236   : > { %883 = vmatmul.mubr.msk.bf16.vlgmr.msra.gmra.mrb[0].mxu1 %vm247_vm1, %v305_v25 }
 0x237   : > { %887 = vmatpush3.bf16.xpose.msra.mxu1 %v366_v24  ;;  %888 = vmatprep.mubr.msk.bf16.mxu1 %vm1054_vm0, %v1053_v0 }
 0x238   : > { %898 = vmatprep.subr.bf16.mxu1 %v1053_v0 }
 0x23e   : > { %889 = vmatmul.mubr.msk.bf16.vlgmr.msra.gmra.mrb[4].mxu1 %vm247_vm1, %v359_v27 }
 0x23f   : > { %899 = vmatpush3.bf16.xpose.msra.mxu1 %v477_v29  ;;  %900 = vmatprep.mubr.msk.bf16.mxu1 %vm1054_vm0, %v1053_v0 }
 0x240   : > { %910 = vmatprep.subr.bf16.mxu1 %v1053_v0 }
 0x246   : > { %901 = vmatmul.mubr.msk.bf16.vlgmr.msra.gmra.mrb[8].mxu1 %vm247_vm1, %v470_v28 }
 0x247   : > { %911 = vmatpush3.bf16.xpose.msra.mxu1 %v588_v31  ;;  %912 = vmatprep.mubr.msk.bf16.mxu1 %vm1054_vm0, %v1053_v0 }
 0x24e   : > { %913 = vmatmul.mubr.msk.bf16.vlgmr.msra.gmra.mrb[12].mxu1 %vm247_vm1, %v581_v32 }
 0x309   : > { %v1198_v33 = vpop.f32.mrb[0].mxu1 }
 0x30a   : > { %v884_v34 = vpop.f32.mrb[1].mxu1 }
 0x30b   : > { %v353_v35 = vpop.f32.mrb[2].mxu1 }
 0x30c   : > { %v885_v36 = vpop.f32.mrb[3].mxu1 }
 0x311   : > { %v402_v37 = vpop.f32.mrb[4].mxu1 }
 0x312   : > { %v403_v38 = vadd.f32 %v1168_v6, %v402_v37  ;;  %v890_v39 = vpop.f32.mrb[5].mxu1 }
 0x313   : > { %v405_v40 = vpop.f32.mrb[6].mxu1 }
 0x314   : > { %v891_v41 = vpop.f32.mrb[7].mxu1  ;;  %v408_v42 = vsel %vm247_vm1, %v403_v38, -inf }
 0x315   : > { %409 = vmax.xlane.f32.xlu1 %v408_v42 }
 0x319   : > { %v513_v43 = vpop.f32.mrb[8].mxu1 }
 0x31a   : > { %v514_v44 = vadd.f32 %v1168_v6, %v513_v43  ;;  %v902_v45 = vpop.f32.mrb[9].mxu1 }
 0x31b   : > { %v516_v46 = vpop.f32.mrb[10].mxu1 }
 0x31c   : > { %v903_v47 = vpop.f32.mrb[11].mxu1  ;;  %v519_v48 = vsel %vm247_vm1, %v514_v44, -inf }
 0x31d   : > { %520 = vmax.xlane.f32.xlu0 %v519_v48 }
 0x321   : > { %v624_v49 = vpop.f32.mrb[12].mxu1 }
 0x322   : > { %v625_v50 = vadd.f32 %v1168_v6, %v624_v49  ;;  %v914_v51 = vpop.f32.mrb[13].mxu1 }
 0x323   : > { %v627_v52 = vpop.f32.mrb[14].mxu1 }
 0x324   : > { %v915_v53 = vpop.f32.mrb[15].mxu1  ;;  %v630_v54 = vsel %vm247_vm1, %v625_v50, -inf }
 0x325   : > { %631 = vmax.xlane.f32.xlu1 %v630_v54 }
 0x336   : > { %420 = vrot.lane.b32.xlu1 %v1153_v2, %s1059_s22  ;;  %s995_s22 = scalar_lea.vmem %s994_s20, 256 }
 0x337   : > { %p997_p1 = scmp.lt.s32.totalorder %s995_s22, %s989_s13 }
 0x339   : > { %p998_p2 = por %p997_p1, %p996_p0 }
 0x33b   : > { %p999_p3 = pnand %p998_p2, %p992_p13 }
 0x3a2   : > { %v410_v55 = vpop.xlane.xlu1 %409 }
 0x3a3   : > { %v411_v56 = vsub.f32 %v403_v38, %v410_v55 }
 0x3a5   : > { %v412_v57 = vmul.f32 1.442695, %v411_v56 }
 0x3a7   : > { %977 = vpow2.f32 %v412_v57 }
 0x3aa   : > { %v521_v58 = vpop.xlane.xlu0 %520 }
 0x3ab   : > { %v522_v59 = vsub.f32 %v514_v44, %v521_v58 }
 0x3ad   : > { %v523_v60 = vmul.f32 1.442695, %v522_v59 }
 0x3af   : > { %979 = vpow2.f32 %v523_v60 }
 0x3b1   : > { %v978_v61 = vpop.eup %977 }
 0x3b2   : > { %v632_v62 = vpop.xlane.xlu1 %631  ;;  %v414_v63 = vsel %vm247_vm1, %v978_v61, 0.0 }
 0x3b3   : > { %v633_v1 = vsub.f32 %v625_v50, %v632_v62  ;;  %415 = vadd.xlane.f32.xlu0 %v414_v63 }
 0x3b5   : > { %v634_v3 = vmul.f32 1.442695, %v633_v1 }
 0x3b6   : > { %v421_v4 = vpop.permute.xlu1 %420 }
 0x3b7   : > { %981 = vpow2.f32 %v634_v3  ;;  %v426_v5 = vsel %vm312_vm2, %v421_v4, 0 }
 0x3b8   : > { %893 = vmatpush3.bf16.msra.mxu0 %v426_v5 }
 0x3b9   : > { %v980_v6 = vpop.eup %979  ;;  %904 = vmatprep.subr.bf16.mxu0 %v1053_v0 }
 0x3ba   : > { %v525_v7 = vsel %vm247_vm1, %v980_v6, 0.0 }
 0x3bb   : > { %526 = vadd.xlane.f32.xlu1 %v525_v7 }
 0x3c1   : > { %v982_v8 = vpop.eup %981 }
 0x3c2   : > { %v636_v9 = vsel %vm247_vm1, %v982_v8, 0.0 }
 0x3c3   : > { %637 = vadd.xlane.f32.xlu0 %v636_v9 }
 0x3cc   : > { %642 = vrot.lane.b32.xlu1 %v1153_v2, %s1060_s23 }
 0x3d9   : > { %531 = vrot.lane.b32.xlu0 %v1153_v2, %s1061_s27 }
 0x440   : > { %v416_v10 = vpop.xlane.xlu0 %415 }
 0x441   : > { %983 = vrcp.f32 %v416_v10 }
 0x448   : > { %v527_v11 = vpop.xlane.xlu1 %526 }
 0x449   : > { %985 = vrcp.f32 %v527_v11 }
 0x44b   : > { %v984_v12 = vpop.eup %983 }
 0x44c   : > { %v418_v13 = vmul.f32 %v984_v12, %v978_v61  ;;  %v643_v19 = vpop.permute.xlu1 %642 }
 0x44d   : > { %v648_v21 = vsel %vm312_vm2, %v643_v19, 0 }
 0x44e   : > { %v419_v14 = vpack.c.bf16 %v418_v13, %v418_v13  ;;  %v468_v22 = vadd.f32 %v418_v13, %v1179_v23 }
 0x450   : > { %v638_v15 = vpop.xlane.xlu0 %637  ;;  %895 = vmatmul.mubr.msk.bf16.vlgmr.msra.gmra.mrb[4].mxu0 %vm247_vm1, %v419_v14 }
 0x451   : > { %987 = vrcp.f32 %v638_v15  ;;  %906 = vmatprep.mubr.msk.bf16.mxu0 %vm1054_vm0, %v1053_v0 }
 0x453   : > { %v986_v16 = vpop.eup %985 }
 0x454   : > { %v529_v17 = vmul.f32 %v986_v16, %v980_v6  ;;  %v532_v18 = vpop.permute.xlu0 %531 }
 0x455   : > { %v537_v2 = vsel %vm312_vm2, %v532_v18, 0 }
 0x456   : > { %905 = vmatpush3.bf16.msra.mxu0 %v537_v2  ;;  %v530_v20 = vpack.c.bf16 %v529_v17, %v529_v17  ;;  %v579_v26 = vadd.f32 %v529_v17, %v468_v22 }
 0x457   : > { %916 = vmatprep.subr.bf16.mxu0 %v1053_v0 }
 0x459   : > { %907 = vmatmul.mubr.msk.bf16.vlgmr.msra.gmra.mrb[8].mxu0 %vm247_vm1, %v530_v20 }
 0x45a   : > { %917 = vmatpush3.bf16.msra.mxu0 %v648_v21  ;;  %918 = vmatprep.mubr.msk.bf16.mxu0 %vm1054_vm0, %v1053_v0 }
 0x45b   : > { %v988_v24 = vpop.eup %987 }
 0x45c   : > { %v640_v25 = vmul.f32 %v988_v24, %v982_v8 }
 0x45e   : > { %v641_v27 = vpack.c.bf16 %v640_v25, %v640_v25  ;;  %v690_v28 = vadd.f32 %v640_v25, %v579_v26 }
 0x460   : > { %v710_v29 = vmul.f32 0.25, %v690_v28 }
 0x461   : > { %919 = vmatmul.mubr.msk.bf16.vlgmr.msra.gmra.mrb[12].mxu0 %vm247_vm1, %v641_v27 }
 0x462   : > { %711 = vst.msk [vmem:[%s219_s5] sm:$0xff] %vm247_vm1, %v710_v29 }
 0x523   : > { %v462_v30 = vpop.f32.mrb[4].mxu0 }
 0x524   : > { %692 = vrot.lane.b32.xlu1 %v462_v30, %s1062_s6  ;;  %v896_v0 = vpop.f32.mrb[5].mxu0 }
 0x525   : > { %v465_v31 = vpop.f32.mrb[6].mxu0 }
 0x526   : > { %v897_v23 = vpop.f32.mrb[7].mxu0 }
 0x527   : > { %1002 = shalt.err (!%p999_p3)
}
 0x528   : > { %s1003_s19 = scalar_lea.hbm %s1231_s11, 128  ;;  %s1007_s29 = scalar_lea.hbm %s1277_s4, 256 }
 0x529   : > { %p1004_p4 = scmp.ne.s32.totalorder %s1231_s11, %s1003_s19  ;;  %p1008_p9 = scmp.lt.u32.totalorder %s1231_s11, %s1277_s4 }
 0x52a   : > { %p1009_p10 = scmp.lt.u32.totalorder %s1007_s29, %s1003_s19  ;;  %p1011_p12 = scmp.lt.u32.totalorder %s1003_s19, %s1231_s11 }
 0x52b   : > { %p1005_p7 = pnand %p1004_p4, %p1129_p5 }
 0x52c   : > { %p1010_p11 = por %p1009_p10, %p1008_p9 }
 0x52d   : > { %p1006_p8 = pneg %p1005_p7 }
 0x52e   : > { %p1012_p13 = por %p1011_p12, %p1010_p11 }
 0x530   : > { %p1013_p0 = pnand %p1012_p13, %p1006_p8 }
 0x532   : > { %1016 = shalt.err (!%p1013_p0)
}
 0x533   : > { %922 = dma.vmem_to_hbm [thread:$0]  (%p1129_p5), %s734_s8, 128, %s1231_s11, %s717_s12   ;;  %v573_v32 = vpop.f32.mrb[8].mxu0  ;;  %vm704_vm3 = vcmask 130048   ;;  %vm706_vm4 = vcmask 195584   ;;  %vm708_vm5 = vcmask 261120  }
 0x534   : > { %s1064_s6 = smov 16   ;;  %v908_v34 = vpop.f32.mrb[9].mxu0  ;;  %s1065_s7 = smov 24  }
 0x535   : > { %696 = vrot.lane.b32.xlu0 %v573_v32, %s1064_s6  ;;  %v576_v35 = vpop.f32.mrb[10].mxu0  ;;  %s234_s9 = scalar_lea.vmem %s1276_s3, %s1147_s28 }
 0x536   : > { %v909_v36 = vpop.f32.mrb[11].mxu0 }
 0x537   : > { %v684_v37 = vpop.f32.mrb[12].mxu0 }
 0x538   : > { %700 = vrot.lane.b32.xlu1 %v684_v37, %s1065_s7  ;;  %v920_v38 = vpop.f32.mrb[13].mxu0 }
 0x539   : > { %v687_v39 = vpop.f32.mrb[14].mxu0 }
 0x53a   : > { %v921_v40 = vpop.f32.mrb[15].mxu0 }
 0x596   : > { %v693_v41 = vpop.permute.xlu1 %692 }
 0x597   : > { %v703_v43 = vsel %vm247_vm1, %v1198_v33, %v693_v41 }
 0x5a7   : > { %v697_v42 = vpop.permute.xlu0 %696 }
 0x5a8   : > { %v705_v44 = vsel %vm704_vm3, %v703_v43, %v697_v42 }
 0x5aa   : > { %v701_v45 = vpop.permute.xlu1 %700 }
 0x5ab   : > { %v707_v46 = vsel %vm706_vm4, %v705_v44, %v701_v45 }
 0x5ac   : > { %709 = vst.msk [vmem:[%s234_s9] sm:$0xff] %vm708_vm5, %v707_v46 }
 0x5ad PF: > { %p928_p5 = scmp.ge.s32.totalorder %s1051_s18, 2  ;;  %s752_s10 = sand.u32 1, %s1039_s15  }
 0x5ae   : > { %s753_s11 = scalar_lea.sflag [#allocation3], %s752_s10 }
 0x5af   : > { %p925_p1 = pnand %p928_p5, %p1133_p6 }
 0x5b1   : > { %1034 = dma.done.wait (!%p925_p1), %s753_s11, 128  }
 0x5b2   : > { %1036 = vsyncadd (!%p925_p1), %s753_s11, 4294967168  ;;  %p15_p2 = scmp.ge.s32.totalorder %s1116_s21, 4   ;;  %s1280_s15 = smov %s1043_s16 }
 0x5b3   : > { %s1281_s16 = smov %s1047_s17  ;;  %s1282_s17 = smov %s1127_s24 }
 0x5b4   : > { %s1283_s18 = smov %s1116_s21  ;;  %17 = sbr.rel (!%p15_p2) target bundleno = 3 (0x3), region = 85 }
 0x5bb   :  { %758 = vsyncpa [#allocation3], 1 }
 0x5bc   :  { %760 = vsyncpa [#allocation3 + $0x1], 1 }

</bundles_post_ra>
